<compile_context>
chip_gen: v7x
topology: tpu7x:2x2x1
jax: 0.10.0
libtpu: 0.0.40
codegen_flags: <defaults>
</compile_context>

<pallas_src>
import jax
import jax.numpy as jnp
from jax.experimental import pallas as pl
from jax.experimental.pallas import tpu as pltpu

ENC_DIMS = [28 * 28, 128, 64, 12, 2]     # encoder: 784 -> 128 -> 64 -> 12 -> 2
DEC_DIMS = [2, 12, 64, 128, 28 * 28]     # decoder: 2 -> 12 -> 64 -> 128 -> 784
D_IN = 28 * 28                           # 784
D_LATENT = 2

# Layer dims actually executed inside the kernel (after bottleneck fusion).
_KERNEL_LAYER_DIMS = [
    (784, 128), (128, 64), (64, 12), (12, 2),      # encoder (+ z head)
    (12, 12), (12, 64), (64, 128), (128, 784),     # fused 12->12, then decoder
]


def ae_kernel(x_ref,
              ew1, eb1, ew2, eb2, ew3, eb3, ew4, eb4,
              wf, bf,                      # fused (12->2)->(2->12) bottleneck
              dw2, db2, dw3, db3, dw4, db4,
              z_ref, y_ref):
    """Full autoencoder forward for one batch tile, entirely in VMEM.

    Weights are bf16, biases f32; all matmuls accumulate in f32 on the MXU and
    all elementwise math is f32 (v5e VPU/EUP have no bf16 support).
    """
    # x arrives f32 straight from HBM; cast to bf16 once on the VPU so every
    # matmul runs as bf16 x bf16 -> f32 on the MXU.
    x = x_ref[...].astype(jnp.bfloat16)                         # (TB, 784)

    # ---- encoder ----
    h = jnp.dot(x, ew1[...], preferred_element_type=jnp.float32) + eb1[...]
    h = jnp.maximum(h, 0.0).astype(jnp.bfloat16)                # ReLU
    h = jnp.dot(h, ew2[...], preferred_element_type=jnp.float32) + eb2[...]
    h = jnp.maximum(h, 0.0).astype(jnp.bfloat16)                # ReLU
    h = jnp.dot(h, ew3[...], preferred_element_type=jnp.float32) + eb3[...]
    h3 = jnp.maximum(h, 0.0).astype(jnp.bfloat16)               # ReLU, (TB, 12)

    # Latent output z = h3 @ ew4 + eb4 (off the decoder critical path).
    z = jnp.dot(h3, ew4[...], preferred_element_type=jnp.float32) + eb4[...]
    z_ref[...] = z.astype(z_ref.dtype)

    # ---- decoder ----
    # First decoder layer fused with the encoder output layer through the
    # identity LeakyReLU(negative_slope=1.0):
    #   d1 = z @ dw1 + db1 = h3 @ (ew4 @ dw1) + (eb4 @ dw1 + db1)
    d = jnp.dot(h3, wf[...], preferred_element_type=jnp.float32) + bf[...]
    d = d.astype(jnp.bfloat16)                                  # LeakyReLU(1.0) == identity
    d = jnp.dot(d, dw2[...], preferred_element_type=jnp.float32) + db2[...]
    d = jnp.maximum(d, 0.0).astype(jnp.bfloat16)                # ReLU
    d = jnp.dot(d, dw3[...], preferred_element_type=jnp.float32) + db3[...]
    d = jnp.maximum(d, 0.0).astype(jnp.bfloat16)                # ReLU
    y = jnp.dot(d, dw4[...], preferred_element_type=jnp.float32) + db4[...]
    y_ref[...] = jnp.tanh(y).astype(y_ref.dtype)                # (TB, 784)


def init_params(key):
    """8 (w, b) pairs (4 encoder, 4 decoder), weights already (in, out)."""
    params = []
    dims = list(zip(ENC_DIMS[:-1], ENC_DIMS[1:])) + list(zip(DEC_DIMS[:-1], DEC_DIMS[1:]))
    for (din, dout) in dims:
        key, kw, kb = jax.random.split(key, 3)
        bound = 1.0 / jnp.sqrt(jnp.float32(din))
        w = jax.random.uniform(kw, (din, dout), jnp.float32, -bound, bound)
        b = jax.random.uniform(kb, (1, dout), jnp.float32, -bound, bound)
        params.append((w, b))
    return params


def _prepare_kernel_params(params):
    """Fuse the bottleneck and cast weights to bf16 (biases stay f32)."""
    (ew1, eb1), (ew2, eb2), (ew3, eb3), (ew4, eb4), \
        (dw1, db1), (dw2, db2), (dw3, db3), (dw4, db4) = params

    # Fuse encoder-output layer and decoder-input layer (LeakyReLU(1.0) == id).
    wf = ew4 @ dw1                                # (12, 12)
    bf = eb4 @ dw1 + db1                          # (1, 12)

    weights = [w.astype(jnp.bfloat16)
               for w in (ew1, ew2, ew3, ew4, wf, dw2, dw3, dw4)]
    biases = [b.astype(jnp.float32)
              for b in (eb1, eb2, eb3, eb4, bf, db2, db3, db4)]

    flat = []
    for w, b in zip(weights, biases):
        flat.extend([w, b])
    return flat


def encoder_decoder_forward(x, params, *, block_batch=256):
    """Pallas forward. x: (B, 784) f32. Returns (z: (B, 2), y: (B, 784)) f32."""
    B, D = x.shape
    assert D == D_IN

    # Sublane-aligned batch tile; pad the batch to a multiple of TB if needed.
    TB = min(block_batch, B)
    TB = max(8, ((TB + 7) // 8) * 8)
    Bpad = ((B + TB - 1) // TB) * TB
    xp = x if Bpad == B else jnp.pad(x, ((0, Bpad - B), (0, 0)))

    flat = _prepare_kernel_params(params)

    # x / z / y are tiled over the batch grid axis; params are replicated
    # full-array blocks (constant index_map -> VMEM-resident across steps).
    x_spec = pl.BlockSpec((TB, D_IN), lambda i: (i, 0))
    param_specs = [pl.BlockSpec(p.shape, lambda i: (0, 0)) for p in flat]
    z_spec = pl.BlockSpec((TB, D_LATENT), lambda i: (i, 0))
    y_spec = pl.BlockSpec((TB, D_IN), lambda i: (i, 0))

    # Cost estimate for XLA scheduling around the custom call.
    flops = 2 * Bpad * sum(din * dout for din, dout in _KERNEL_LAYER_DIMS)
    param_bytes = sum(int(p.size) * p.dtype.itemsize for p in flat)
    io_bytes = (int(xp.size) * xp.dtype.itemsize
                + Bpad * D_LATENT * 4 + Bpad * D_IN * 4)
    cost = pl.CostEstimate(flops=int(flops),
                           transcendentals=int(Bpad * D_IN),
                           bytes_accessed=int(param_bytes + io_bytes))

    z, y = pl.pallas_call(
        ae_kernel,
        out_shape=(
            jax.ShapeDtypeStruct((Bpad, D_LATENT), jnp.float32),
            jax.ShapeDtypeStruct((Bpad, D_IN), jnp.float32),
        ),
        grid_spec=pltpu.PrefetchScalarGridSpec(
            num_scalar_prefetch=0,
            grid=(Bpad // TB,),
            in_specs=[x_spec] + param_specs,
            out_specs=(z_spec, y_spec),
        ),
        compiler_params=pltpu.CompilerParams(
            dimension_semantics=("parallel",),   # batch tiles shard across TCs
            vmem_limit_bytes=32 * 1024 * 1024,   # safe on v5e/v6e/v7x
        ),
        cost_estimate=cost,
    )(xp, *flat)

    if Bpad != B:
        z, y = z[:B], y[:B]
    return z, y


def reference_forward(x, params):
    """Pure-JAX f32 reference matching the PyTorch module exactly."""
    (ew1, eb1), (ew2, eb2), (ew3, eb3), (ew4, eb4), \
        (dw1, db1), (dw2, db2), (dw3, db3), (dw4, db4) = params
    h = jnp.maximum(x @ ew1 + eb1, 0.0)
    h = jnp.maximum(h @ ew2 + eb2, 0.0)
    h = jnp.maximum(h @ ew3 + eb3, 0.0)
    z = h @ ew4 + eb4
    d = z @ dw1 + db1
    d = jnp.where(d >= 0, d, 1.0 * d)            # LeakyReLU(negative_slope=1.0)
    d = jnp.maximum(d @ dw2 + db2, 0.0)
    d = jnp.maximum(d @ dw3 + db3, 0.0)
    y = jnp.tanh(d @ dw4 + db4)
    return z, y


if __name__ == "__main__":
    key = jax.random.PRNGKey(0)
    k_x, k_p = jax.random.split(key)

    B = 64
    x = jax.random.normal(k_x, (B, D_IN), jnp.float32)
    params = init_params(k_p)

    # block_batch=32 -> grid=(2,): exercises batch tiling / megacore sharding.
    z, y = encoder_decoder_forward(x, params, block_batch=32)
    jax.block_until_ready((z, y))

    z_ref, y_ref = reference_forward(x, params)
    assert z.shape == (B, D_LATENT) and y.shape == (B, D_IN)
    # bf16 matmul operands with f32 accumulation -> compare with ~5e-2 tolerance.
    assert jnp.allclose(z, z_ref, atol=5e-2, rtol=5e-2), float(jnp.max(jnp.abs(z - z_ref)))
    assert jnp.allclose(y, y_ref, atol=5e-2, rtol=5e-2), float(jnp.max(jnp.abs(y - y_ref)))

    print("KERNEL_OK")
</pallas_src>

<mosaic_0001>
module attributes {stable_mosaic.version = 11 : i64} {
  func.func @ae_kernel(%arg0: i32, %arg1: memref<32x784xf32, #tpu.memory_space<vmem>>, %arg2: memref<784x128xbf16, #tpu.memory_space<vmem>>, %arg3: memref<1x128xf32, #tpu.memory_space<vmem>>, %arg4: memref<128x64xbf16, #tpu.memory_space<vmem>>, %arg5: memref<1x64xf32, #tpu.memory_space<vmem>>, %arg6: memref<64x12xbf16, #tpu.memory_space<vmem>>, %arg7: memref<1x12xf32, #tpu.memory_space<vmem>>, %arg8: memref<12x2xbf16, #tpu.memory_space<vmem>>, %arg9: memref<1x2xf32, #tpu.memory_space<vmem>>, %arg10: memref<12x12xbf16, #tpu.memory_space<vmem>>, %arg11: memref<1x12xf32, #tpu.memory_space<vmem>>, %arg12: memref<12x64xbf16, #tpu.memory_space<vmem>>, %arg13: memref<1x64xf32, #tpu.memory_space<vmem>>, %arg14: memref<64x128xbf16, #tpu.memory_space<vmem>>, %arg15: memref<1x128xf32, #tpu.memory_space<vmem>>, %arg16: memref<128x784xbf16, #tpu.memory_space<vmem>>, %arg17: memref<1x784xf32, #tpu.memory_space<vmem>>, %arg18: memref<32x2xf32, #tpu.memory_space<vmem>>, %arg19: memref<32x784xf32, #tpu.memory_space<vmem>>) attributes {dimension_semantics = [#tpu.dimension_semantics<parallel>], iteration_bounds = array<i64: 2>, scalar_prefetch = 0 : i64, scratch_operands = 0 : i64, tpu.core_type = #tpu.core_type<tc>, window_params = [{transform_indices = @transform_0, window_bounds = array<i64: 32, 784>}, {pipeline_mode = #tpu.pipeline_mode<synchronous>, transform_indices = @transform_1, window_bounds = array<i64: 784, 128>}, {pipeline_mode = #tpu.pipeline_mode<synchronous>, transform_indices = @transform_2, window_bounds = array<i64: 1, 128>}, {pipeline_mode = #tpu.pipeline_mode<synchronous>, transform_indices = @transform_3, window_bounds = array<i64: 128, 64>}, {pipeline_mode = #tpu.pipeline_mode<synchronous>, transform_indices = @transform_4, window_bounds = array<i64: 1, 64>}, {pipeline_mode = #tpu.pipeline_mode<synchronous>, transform_indices = @transform_5, window_bounds = array<i64: 64, 12>}, {pipeline_mode = #tpu.pipeline_mode<synchronous>, transform_indices = @transform_6, window_bounds = array<i64: 1, 12>}, {pipeline_mode = #tpu.pipeline_mode<synchronous>, transform_indices = @transform_7, window_bounds = array<i64: 12, 2>}, {pipeline_mode = #tpu.pipeline_mode<synchronous>, transform_indices = @transform_8, window_bounds = array<i64: 1, 2>}, {pipeline_mode = #tpu.pipeline_mode<synchronous>, transform_indices = @transform_9, window_bounds = array<i64: 12, 12>}, {pipeline_mode = #tpu.pipeline_mode<synchronous>, transform_indices = @transform_10, window_bounds = array<i64: 1, 12>}, {pipeline_mode = #tpu.pipeline_mode<synchronous>, transform_indices = @transform_11, window_bounds = array<i64: 12, 64>}, {pipeline_mode = #tpu.pipeline_mode<synchronous>, transform_indices = @transform_12, window_bounds = array<i64: 1, 64>}, {pipeline_mode = #tpu.pipeline_mode<synchronous>, transform_indices = @transform_13, window_bounds = array<i64: 64, 128>}, {pipeline_mode = #tpu.pipeline_mode<synchronous>, transform_indices = @transform_14, window_bounds = array<i64: 1, 128>}, {pipeline_mode = #tpu.pipeline_mode<synchronous>, transform_indices = @transform_15, window_bounds = array<i64: 128, 784>}, {pipeline_mode = #tpu.pipeline_mode<synchronous>, transform_indices = @transform_16, window_bounds = array<i64: 1, 784>}, {transform_indices = @transform_17, window_bounds = array<i64: 32, 2>}, {transform_indices = @transform_18, window_bounds = array<i64: 32, 784>}]} {
    %c0 = arith.constant 0 : index
    %c0_0 = arith.constant 0 : index
    %0 = vector.load %arg1[%c0, %c0_0] : memref<32x784xf32, #tpu.memory_space<vmem>>, vector<32x784xf32>
    %1 = arith.truncf %0 : vector<32x784xf32> to vector<32x784xbf16>
    %c0_1 = arith.constant 0 : index
    %c0_2 = arith.constant 0 : index
    %2 = vector.load %arg2[%c0_1, %c0_2] : memref<784x128xbf16, #tpu.memory_space<vmem>>, vector<784x128xbf16>
    %cst = arith.constant dense<0.000000e+00> : vector<32x128xf32>
    %3 = tpu.matmul %1, %2, %cst {dimension_numbers = #tpu.dot_dimension_numbers<[1], [0], [0], [1], [0, 0, 1, 1], [], []>} : vector<32x784xbf16>, vector<784x128xbf16>, vector<32x128xf32> -> vector<32x128xf32>
    %c0_3 = arith.constant 0 : index
    %c0_4 = arith.constant 0 : index
    %4 = vector.load %arg3[%c0_3, %c0_4] : memref<1x128xf32, #tpu.memory_space<vmem>>, vector<1x128xf32>
    %5 = vector.broadcast %4 : vector<1x128xf32> to vector<32x128xf32>
    %6 = arith.addf %3, %5 : vector<32x128xf32>
    %cst_5 = arith.constant 0.000000e+00 : f32
    %7 = vector.broadcast %cst_5 : f32 to vector<32x128xf32>
    %8 = arith.maximumf %6, %7 : vector<32x128xf32>
    %9 = arith.truncf %8 : vector<32x128xf32> to vector<32x128xbf16>
    %c0_6 = arith.constant 0 : index
    %c0_7 = arith.constant 0 : index
    %10 = vector.load %arg4[%c0_6, %c0_7] : memref<128x64xbf16, #tpu.memory_space<vmem>>, vector<128x64xbf16>
    %cst_8 = arith.constant dense<0.000000e+00> : vector<32x64xf32>
    %11 = tpu.matmul %9, %10, %cst_8 {dimension_numbers = #tpu.dot_dimension_numbers<[1], [0], [0], [1], [0, 0, 1, 1], [], []>} : vector<32x128xbf16>, vector<128x64xbf16>, vector<32x64xf32> -> vector<32x64xf32>
    %c0_9 = arith.constant 0 : index
    %c0_10 = arith.constant 0 : index
    %12 = vector.load %arg5[%c0_9, %c0_10] : memref<1x64xf32, #tpu.memory_space<vmem>>, vector<1x64xf32>
    %13 = vector.broadcast %12 : vector<1x64xf32> to vector<32x64xf32>
    %14 = arith.addf %11, %13 : vector<32x64xf32>
    %cst_11 = arith.constant 0.000000e+00 : f32
    %15 = vector.broadcast %cst_11 : f32 to vector<32x64xf32>
    %16 = arith.maximumf %14, %15 : vector<32x64xf32>
    %17 = arith.truncf %16 : vector<32x64xf32> to vector<32x64xbf16>
    %c0_12 = arith.constant 0 : index
    %c0_13 = arith.constant 0 : index
    %18 = vector.load %arg6[%c0_12, %c0_13] : memref<64x12xbf16, #tpu.memory_space<vmem>>, vector<64x12xbf16>
    %cst_14 = arith.constant dense<0.000000e+00> : vector<32x12xf32>
    %19 = tpu.matmul %17, %18, %cst_14 {dimension_numbers = #tpu.dot_dimension_numbers<[1], [0], [0], [1], [0, 0, 1, 1], [], []>} : vector<32x64xbf16>, vector<64x12xbf16>, vector<32x12xf32> -> vector<32x12xf32>
    %c0_15 = arith.constant 0 : index
    %c0_16 = arith.constant 0 : index
    %20 = vector.load %arg7[%c0_15, %c0_16] : memref<1x12xf32, #tpu.memory_space<vmem>>, vector<1x12xf32>
    %21 = vector.broadcast %20 : vector<1x12xf32> to vector<32x12xf32>
    %22 = arith.addf %19, %21 : vector<32x12xf32>
    %cst_17 = arith.constant 0.000000e+00 : f32
    %23 = vector.broadcast %cst_17 : f32 to vector<32x12xf32>
    %24 = arith.maximumf %22, %23 : vector<32x12xf32>
    %25 = arith.truncf %24 : vector<32x12xf32> to vector<32x12xbf16>
    %c0_18 = arith.constant 0 : index
    %c0_19 = arith.constant 0 : index
    %26 = vector.load %arg8[%c0_18, %c0_19] : memref<12x2xbf16, #tpu.memory_space<vmem>>, vector<12x2xbf16>
    %cst_20 = arith.constant dense<0.000000e+00> : vector<32x2xf32>
    %27 = tpu.matmul %25, %26, %cst_20 {dimension_numbers = #tpu.dot_dimension_numbers<[1], [0], [0], [1], [0, 0, 1, 1], [], []>} : vector<32x12xbf16>, vector<12x2xbf16>, vector<32x2xf32> -> vector<32x2xf32>
    %c0_21 = arith.constant 0 : index
    %c0_22 = arith.constant 0 : index
    %28 = vector.load %arg9[%c0_21, %c0_22] : memref<1x2xf32, #tpu.memory_space<vmem>>, vector<1x2xf32>
    %29 = vector.broadcast %28 : vector<1x2xf32> to vector<32x2xf32>
    %30 = arith.addf %27, %29 : vector<32x2xf32>
    %c0_23 = arith.constant 0 : index
    %c0_24 = arith.constant 0 : index
    %31 = vector.load %arg18[%c0_23, %c0_24] : memref<32x2xf32, #tpu.memory_space<vmem>>, vector<32x2xf32>
    tpu.vector_store %arg18[%c0_23, %c0_24], %30 {strides = array<i32>} : memref<32x2xf32, #tpu.memory_space<vmem>>, vector<32x2xf32>,
    %c0_25 = arith.constant 0 : index
    %c0_26 = arith.constant 0 : index
    %32 = vector.load %arg10[%c0_25, %c0_26] : memref<12x12xbf16, #tpu.memory_space<vmem>>, vector<12x12xbf16>
    %cst_27 = arith.constant dense<0.000000e+00> : vector<32x12xf32>
    %33 = tpu.matmul %25, %32, %cst_27 {dimension_numbers = #tpu.dot_dimension_numbers<[1], [0], [0], [1], [0, 0, 1, 1], [], []>} : vector<32x12xbf16>, vector<12x12xbf16>, vector<32x12xf32> -> vector<32x12xf32>
    %c0_28 = arith.constant 0 : index
    %c0_29 = arith.constant 0 : index
    %34 = vector.load %arg11[%c0_28, %c0_29] : memref<1x12xf32, #tpu.memory_space<vmem>>, vector<1x12xf32>
    %35 = vector.broadcast %34 : vector<1x12xf32> to vector<32x12xf32>
    %36 = arith.addf %33, %35 : vector<32x12xf32>
    %37 = arith.truncf %36 : vector<32x12xf32> to vector<32x12xbf16>
    %c0_30 = arith.constant 0 : index
    %c0_31 = arith.constant 0 : index
    %38 = vector.load %arg12[%c0_30, %c0_31] : memref<12x64xbf16, #tpu.memory_space<vmem>>, vector<12x64xbf16>
    %cst_32 = arith.constant dense<0.000000e+00> : vector<32x64xf32>
    %39 = tpu.matmul %37, %38, %cst_32 {dimension_numbers = #tpu.dot_dimension_numbers<[1], [0], [0], [1], [0, 0, 1, 1], [], []>} : vector<32x12xbf16>, vector<12x64xbf16>, vector<32x64xf32> -> vector<32x64xf32>
    %c0_33 = arith.constant 0 : index
    %c0_34 = arith.constant 0 : index
    %40 = vector.load %arg13[%c0_33, %c0_34] : memref<1x64xf32, #tpu.memory_space<vmem>>, vector<1x64xf32>
    %41 = vector.broadcast %40 : vector<1x64xf32> to vector<32x64xf32>
    %42 = arith.addf %39, %41 : vector<32x64xf32>
    %cst_35 = arith.constant 0.000000e+00 : f32
    %43 = vector.broadcast %cst_35 : f32 to vector<32x64xf32>
    %44 = arith.maximumf %42, %43 : vector<32x64xf32>
    %45 = arith.truncf %44 : vector<32x64xf32> to vector<32x64xbf16>
    %c0_36 = arith.constant 0 : index
    %c0_37 = arith.constant 0 : index
    %46 = vector.load %arg14[%c0_36, %c0_37] : memref<64x128xbf16, #tpu.memory_space<vmem>>, vector<64x128xbf16>
    %cst_38 = arith.constant dense<0.000000e+00> : vector<32x128xf32>
    %47 = tpu.matmul %45, %46, %cst_38 {dimension_numbers = #tpu.dot_dimension_numbers<[1], [0], [0], [1], [0, 0, 1, 1], [], []>} : vector<32x64xbf16>, vector<64x128xbf16>, vector<32x128xf32> -> vector<32x128xf32>
    %c0_39 = arith.constant 0 : index
    %c0_40 = arith.constant 0 : index
    %48 = vector.load %arg15[%c0_39, %c0_40] : memref<1x128xf32, #tpu.memory_space<vmem>>, vector<1x128xf32>
    %49 = vector.broadcast %48 : vector<1x128xf32> to vector<32x128xf32>
    %50 = arith.addf %47, %49 : vector<32x128xf32>
    %cst_41 = arith.constant 0.000000e+00 : f32
    %51 = vector.broadcast %cst_41 : f32 to vector<32x128xf32>
    %52 = arith.maximumf %50, %51 : vector<32x128xf32>
    %53 = arith.truncf %52 : vector<32x128xf32> to vector<32x128xbf16>
    %c0_42 = arith.constant 0 : index
    %c0_43 = arith.constant 0 : index
    %54 = vector.load %arg16[%c0_42, %c0_43] : memref<128x784xbf16, #tpu.memory_space<vmem>>, vector<128x784xbf16>
    %cst_44 = arith.constant dense<0.000000e+00> : vector<32x784xf32>
    %55 = tpu.matmul %53, %54, %cst_44 {dimension_numbers = #tpu.dot_dimension_numbers<[1], [0], [0], [1], [0, 0, 1, 1], [], []>} : vector<32x128xbf16>, vector<128x784xbf16>, vector<32x784xf32> -> vector<32x784xf32>
    %c0_45 = arith.constant 0 : index
    %c0_46 = arith.constant 0 : index
    %56 = vector.load %arg17[%c0_45, %c0_46] : memref<1x784xf32, #tpu.memory_space<vmem>>, vector<1x784xf32>
    %57 = vector.broadcast %56 : vector<1x784xf32> to vector<32x784xf32>
    %58 = arith.addf %55, %57 : vector<32x784xf32>
    %59 = math.tanh %58 : vector<32x784xf32>
    %c0_47 = arith.constant 0 : index
    %c0_48 = arith.constant 0 : index
    %60 = vector.load %arg19[%c0_47, %c0_48] : memref<32x784xf32, #tpu.memory_space<vmem>>, vector<32x784xf32>
    tpu.vector_store %arg19[%c0_47, %c0_48], %59 {strides = array<i32>} : memref<32x784xf32, #tpu.memory_space<vmem>>, vector<32x784xf32>,
    return
  }
  func.func @transform_0(%arg0: i32) -> (i32, i32) {
    %c0_i32 = arith.constant 0 : i32
    %c0_i32_0 = arith.constant 0 : i32
    return %arg0, %c0_i32 : i32, i32
  }
  func.func @transform_1(%arg0: i32) -> (i32, i32) {
    %c0_i32 = arith.constant 0 : i32
    %c0_i32_0 = arith.constant 0 : i32
    %c0_i32_1 = arith.constant 0 : i32
    return %c0_i32, %c0_i32_0 : i32, i32
  }
  func.func @transform_2(%arg0: i32) -> (i32, i32) {
    %c0_i32 = arith.constant 0 : i32
    %c0_i32_0 = arith.constant 0 : i32
    %c0_i32_1 = arith.constant 0 : i32
    return %c0_i32, %c0_i32_0 : i32, i32
  }
  func.func @transform_3(%arg0: i32) -> (i32, i32) {
    %c0_i32 = arith.constant 0 : i32
    %c0_i32_0 = arith.constant 0 : i32
    %c0_i32_1 = arith.constant 0 : i32
    return %c0_i32, %c0_i32_0 : i32, i32
  }
  func.func @transform_4(%arg0: i32) -> (i32, i32) {
    %c0_i32 = arith.constant 0 : i32
    %c0_i32_0 = arith.constant 0 : i32
    %c0_i32_1 = arith.constant 0 : i32
    return %c0_i32, %c0_i32_0 : i32, i32
  }
  func.func @transform_5(%arg0: i32) -> (i32, i32) {
    %c0_i32 = arith.constant 0 : i32
    %c0_i32_0 = arith.constant 0 : i32
    %c0_i32_1 = arith.constant 0 : i32
    return %c0_i32, %c0_i32_0 : i32, i32
  }
  func.func @transform_6(%arg0: i32) -> (i32, i32) {
    %c0_i32 = arith.constant 0 : i32
    %c0_i32_0 = arith.constant 0 : i32
    %c0_i32_1 = arith.constant 0 : i32
    return %c0_i32, %c0_i32_0 : i32, i32
  }
  func.func @transform_7(%arg0: i32) -> (i32, i32) {
    %c0_i32 = arith.constant 0 : i32
    %c0_i32_0 = arith.constant 0 : i32
    %c0_i32_1 = arith.constant 0 : i32
    return %c0_i32, %c0_i32_0 : i32, i32
  }
  func.func @transform_8(%arg0: i32) -> (i32, i32) {
    %c0_i32 = arith.constant 0 : i32
    %c0_i32_0 = arith.constant 0 : i32
    %c0_i32_1 = arith.constant 0 : i32
    return %c0_i32, %c0_i32_0 : i32, i32
  }
  func.func @transform_9(%arg0: i32) -> (i32, i32) {
    %c0_i32 = arith.constant 0 : i32
    %c0_i32_0 = arith.constant 0 : i32
    %c0_i32_1 = arith.constant 0 : i32
    return %c0_i32, %c0_i32_0 : i32, i32
  }
  func.func @transform_10(%arg0: i32) -> (i32, i32) {
    %c0_i32 = arith.constant 0 : i32
    %c0_i32_0 = arith.constant 0 : i32
    %c0_i32_1 = arith.constant 0 : i32
    return %c0_i32, %c0_i32_0 : i32, i32
  }
  func.func @transform_11(%arg0: i32) -> (i32, i32) {
    %c0_i32 = arith.constant 0 : i32
    %c0_i32_0 = arith.constant 0 : i32
    %c0_i32_1 = arith.constant 0 : i32
    return %c0_i32, %c0_i32_0 : i32, i32
  }
  func.func @transform_12(%arg0: i32) -> (i32, i32) {
    %c0_i32 = arith.constant 0 : i32
    %c0_i32_0 = arith.constant 0 : i32
    %c0_i32_1 = arith.constant 0 : i32
    return %c0_i32, %c0_i32_0 : i32, i32
  }
  func.func @transform_13(%arg0: i32) -> (i32, i32) {
    %c0_i32 = arith.constant 0 : i32
    %c0_i32_0 = arith.constant 0 : i32
    %c0_i32_1 = arith.constant 0 : i32
    return %c0_i32, %c0_i32_0 : i32, i32
  }
  func.func @transform_14(%arg0: i32) -> (i32, i32) {
    %c0_i32 = arith.constant 0 : i32
    %c0_i32_0 = arith.constant 0 : i32
    %c0_i32_1 = arith.constant 0 : i32
    return %c0_i32, %c0_i32_0 : i32, i32
  }
  func.func @transform_15(%arg0: i32) -> (i32, i32) {
    %c0_i32 = arith.constant 0 : i32
    %c0_i32_0 = arith.constant 0 : i32
    %c0_i32_1 = arith.constant 0 : i32
    return %c0_i32, %c0_i32_0 : i32, i32
  }
  func.func @transform_16(%arg0: i32) -> (i32, i32) {
    %c0_i32 = arith.constant 0 : i32
    %c0_i32_0 = arith.constant 0 : i32
    %c0_i32_1 = arith.constant 0 : i32
    return %c0_i32, %c0_i32_0 : i32, i32
  }
  func.func @transform_17(%arg0: i32) -> (i32, i32) {
    %c0_i32 = arith.constant 0 : i32
    %c0_i32_0 = arith.constant 0 : i32
    return %arg0, %c0_i32 : i32, i32
  }
  func.func @transform_18(%arg0: i32) -> (i32, i32) {
    %c0_i32 = arith.constant 0 : i32
    %c0_i32_0 = arith.constant 0 : i32
    return %arg0, %c0_i32 : i32, i32
  }
}

</mosaic_0001>

<bundles_post_ra>
// kernel: tpu_custom_call.1
= control target key start
LH: loop header
LB: loop body
LE: loop exit
PB: predicated region body
PF: predicated region fallthrough
CT: control target
= control target key end

     0   :  { %s3974_s0 = inlined_call_operand.vmem [shape: f32[64,784], index: 0, kind: input, shape index: {}]   ;;  %s3975_s1 = inlined_call_operand.vmem [shape: bf16[784,128], index: 1, kind: input, shape index: {}]   ;;  %s3976_s2 = inlined_call_operand.vmem [shape: f32[1,128], index: 2, kind: input, shape index: {}]   ;;  %s3977_s3 = inlined_call_operand.vmem [shape: bf16[128,64], index: 3, kind: input, shape index: {}]   ;;  %s3978_s4 = inlined_call_operand.vmem [shape: f32[1,64], index: 4, kind: input, shape index: {}]   ;;  %s3979_s5 = inlined_call_operand.vmem [shape: bf16[64,12], index: 5, kind: input, shape index: {}]   ;;  %s3980_s6 = inlined_call_operand.vmem [shape: f32[1,12], index: 6, kind: input, shape index: {}]   ;;  %s3981_s7 = inlined_call_operand.vmem [shape: bf16[12,2], index: 7, kind: input, shape index: {}]   ;;  %s3982_s8 = inlined_call_operand.vmem [shape: f32[1,2], index: 8, kind: input, shape index: {}]   ;;  %s3983_s9 = inlined_call_operand.vmem [shape: bf16[12,12], index: 9, kind: input, shape index: {}]   ;;  %s3984_s10 = inlined_call_operand.vmem [shape: f32[1,12], index: 10, kind: input, shape index: {}]   ;;  %s3985_s11 = inlined_call_operand.vmem [shape: bf16[12,64], index: 11, kind: input, shape index: {}]   ;;  %s3986_s12 = inlined_call_operand.vmem [shape: f32[1,64], index: 12, kind: input, shape index: {}]   ;;  %s3987_s13 = inlined_call_operand.vmem [shape: bf16[64,128], index: 13, kind: input, shape index: {}]   ;;  %s3988_s14 = inlined_call_operand.vmem [shape: f32[1,128], index: 14, kind: input, shape index: {}]   ;;  %s3989_s15 = inlined_call_operand.vmem [shape: bf16[128,784], index: 15, kind: input, shape index: {}]   ;;  %s3990_s16 = inlined_call_operand.vmem [shape: f32[1,784], index: 16, kind: input, shape index: {}]   ;;  %s3991_s17 = inlined_call_operand.vmem [shape: f32[64,2], index: 17, kind: output, shape index: {0}]   ;;  %s3992_s18 = inlined_call_operand.hbm [shape: f32[64,784], index: 18, kind: output, shape index: {1}]  }
   0x1   :  { %4003 = sst [smem:[#allocation12_spill]] %s3974_s0 }
   0x2   :  { %4004 = sst [smem:[#allocation13_spill]] %s3975_s1 }
   0x3   :  { %4005 = sst [smem:[#allocation14_spill]] %s3976_s2 }
   0x4   :  { %4006 = sst [smem:[#allocation15_spill]] %s3992_s18 }
   0x5   :  { %24 = vsyncpa [#allocation3], 0 }
   0x6   :  { %26 = vsyncpa [#allocation3 + $0x1], 0  ;;  %s3348_s27 = smov 0   ;;  %s3350_s28 = smov 0  }
   0x7   :  { %s3352_s29 = smov 0   ;;  %s3354_s30 = smov 0  }
   0x8 LB: > { %4007 = sst [smem:[#allocation5_spill]] %s3235_s27  ;;  %s3369_s0 = sadd.s32 4294967295, %s3247_s30   ;;  %s3247_s30 = sphi %s3354_s30, %s4024_s30   ;;  %s3243_s29 = sphi %s3352_s29, %s4026_s29   ;;  %s3239_s28 = sphi %s3350_s28, %s4028_s28   ;;  %s3235_s27 = sphi %s3348_s27, %s4027_s27  }
   0x9   : > { %4008 = sst [smem:[#allocation6_spill]] %s3243_s29  ;;  %s2561_s19 = sadd.s32 4294967294, %s3247_s30  }
   0xa   : > { %4009 = sst [smem:[#allocation7_spill]] %s3247_s30  ;;  %s3373_s1 = sadd.s32 1, %s3247_s30  }
   0xb   : > { %4010 = sst [smem:[#allocation8_spill]] %s3373_s1  ;;  %s427_s20 = sadd.s32 1, %s3243_s29 }
   0xc   : > { %s424_s21 = ssub.s32 %s3247_s30, %s3373_s1  ;;  %p437_p0 = scmp.ne.s32.totalorder %s3243_s29, %s3239_s28 }
   0xd   : > { %p425_p1 = scmp.eq.s32.totalorder %s424_s21, 0  ;;  %p438_p2 = scmp.eq.s32.totalorder %s3369_s0, 1 }
   0xe   : > { %p443_p3 = scmp.ne.s32.totalorder %s3239_s28, %s3235_s27  ;;  %p444_p4 = scmp.eq.s32.totalorder %s2561_s19, 1 }
   0xf   : > { %s3384_s22 = scalar_select %p425_p1, %s3243_s29, %s427_s20  }
  0x10   : > { %p3386_p5 = por %p438_p2, %p437_p0  ;;  %p3390_p6 = por %p444_p4, %p443_p3 }
  0x11   : > { %4011 = sst [smem:[#allocation9_spill]] %s3384_s22  ;;  %p2564_p7 = scmp.ge.s32.totalorder %s3247_s30, 1 }
  0x12   : > { %s4012_s2 = scalar_select %p3386_p5, 1, 0 }
  0x13   : > { %s4014_s23 = scalar_select %p3390_p6, 1, 0 }
  0x14   : > { %4013 = sst [smem:[#allocation10_spill]] %s4012_s2  ;;  %p520_p8 = scmp.lt.s32.totalorder %s3247_s30, 3 }
  0x15   : > { %4015 = sst [smem:[#allocation11_spill]] %s4014_s23 }
  0x16   : > { %p521_p9 = pnand %p2564_p7, %p520_p8 }
  0x17   : > { %s4016_s26 = sld [smem:[#allocation13_spill]] (!%p521_p9)  ;;  %s2565_s23 = sshll.u32 (!%p521_p9), %s3369_s0, 2  ;;  %vm1036_vm0 = vcmask (!%p521_p9), 130048   ;;  %vm1410_vm1 = vcmask (!%p521_p9), 523264   ;;  %vm1493_vm2 = vcmask (!%p521_p9), 1045504   ;;  %vm1486_vm3 = vcmask (!%p521_p9), 97280  }
  0x18   : > { %524 = sbr.rel (%p521_p9) target bundleno = 1717 (0x6b5), region = 88  ;;  %p581_p10 = scmp.lt.s32.totalorder (!%p521_p9), %s2565_s23, 7  ;;  %vm1546_vm4 = vcmask (!%p521_p9), 15360  }
  0x19   : > { %s4017_s2 = sld [smem:[#allocation12_spill]] (!%p521_p9)  ;;  %s2938_s27 = smul.u32 (!%p521_p9), 3584, %s3369_s0 }
  0x1a   : > { %s3250_s21 = smov (!%p521_p9), [#allocation2]  }
  0x1b   : > { %s3189_s22 = sshll.u32 (!%p521_p9), %s3250_s21, 4  ;;  %s3190_s22 = int_to_ptr.vmem [resolvable:$false] %s3189_s22 }
  0x1d   : > { %v2981_v0 = vld [vmem:[%s4016_s26 + $0x40] sm:$0xff] (!%p521_p9)   ;;  %v2985_v4 = vld [vmem:[%s4016_s26 + $0x48] sm:$0xff] (!%p521_p9)   ;;  %v2989_v8 = vld [vmem:[%s4016_s26 + $0x50] sm:$0xff] (!%p521_p9)  }
  0x1e   : > { %v2982_v1 = vld [vmem:[%s4016_s26] sm:$0xff] (!%p521_p9)   ;;  %2717 = vmatprep.subr.bf16.mxu0 (!%p521_p9), %v2981_v0  ;;  %v2986_v5 = vld [vmem:[%s4016_s26 + $0x8] sm:$0xff] (!%p521_p9)   ;;  %v2990_v9 = vld [vmem:[%s4016_s26 + $0x10] sm:$0xff] (!%p521_p9)  }
  0x1f   : > { %v2983_v2 = vld [vmem:[%s4016_s26 + $0xc0] sm:$0xff]   ;;  %2718 = vmatpush3.bf16.msra.mxu0 %v2982_v1  ;;  %v2987_v6 = vld [vmem:[%s4016_s26 + $0xc8] sm:$0xff]   ;;  %v2991_v10 = vld [vmem:[%s4016_s26 + $0xd0] sm:$0xff]   ;;  %s4030_s23 = smov (!%p581_p10, %s2565_s23), 7 }
  0x20   : > { %v2984_v3 = vld [vmem:[%s4016_s26 + $0x80] sm:$0xff]   ;;  %2745 = vmatprep.subr.bf16.mxu1 %v2983_v2  ;;  %2719 = vmatprep.subr.bf16.mxu0 %v2985_v4  ;;  %v2988_v7 = vld [vmem:[%s4016_s26 + $0x88] sm:$0xff]   ;;  %v2992_v11 = vld [vmem:[%s4016_s26 + $0x90] sm:$0xff]   ;;  %s2937_s19 = smul.u32 56, %s4030_s23  ;;  %s2568_s29 = sshll.u32 %s4030_s23, 3 }
  0x21   : > { %2746 = vmatpush3.bf16.msra.mxu1 %v2984_v3  ;;  %v2993_v12 = vld [vmem:[%s4016_s26 + $0x58] sm:$0xff]   ;;  %v2997_v16 = vld [vmem:[%s4016_s26 + $0x60] sm:$0xff]   ;;  %v3001_v20 = vld [vmem:[%s4016_s26 + $0x68] sm:$0xff]   ;;  %s591_s20 = scalar_lea.vmem %s3991_s17, %s2568_s29  ;;  %s577_s29 = sand.u32 1, %s3239_s28  }
  0x22   : > { %2747 = vmatprep.subr.bf16.mxu1 %v2987_v6  ;;  %v2994_v13 = vld [vmem:[%s4016_s26 + $0x18] sm:$0xff]   ;;  %v2998_v17 = vld [vmem:[%s4016_s26 + $0x20] sm:$0xff]   ;;  %v3002_v21 = vld [vmem:[%s4016_s26 + $0x28] sm:$0xff]   ;;  %s3490_s30 = scalar_lea.vmem %s4017_s2, %s2937_s19  ;;  %s4018_s2 = sld [smem:[#allocation14_spill]] }
  0x23   : > { %2720 = vmatpush3.bf16.msra.mxu0 %v2986_v5  ;;  %v2995_v14 = vld [vmem:[%s4016_s26 + $0xd8] sm:$0xff]   ;;  %v2999_v18 = vld [vmem:[%s4016_s26 + $0xe0] sm:$0xff]   ;;  %v3003_v22 = vld [vmem:[%s4016_s26 + $0xe8] sm:$0xff]   ;;  %s4020_s23 = sld [smem:[#allocation15_spill]]  ;;  %s3933_s24 = scalar_lea.sflag [#allocation3], %s577_s29 }
  0x24   : > { %2721 = vmatprep.subr.bf16.mxu0 %v2989_v8  ;;  %v2996_v15 = vld [vmem:[%s4016_s26 + $0x98] sm:$0xff]   ;;  %v3000_v19 = vld [vmem:[%s4016_s26 + $0xa0] sm:$0xff]   ;;  %v3004_v23 = vld [vmem:[%s4016_s26 + $0xa8] sm:$0xff]  }
  0x25   : > { %2748 = vmatpush3.bf16.msra.mxu1 %v2988_v7  ;;  %v3005_v24 = vld [vmem:[%s4016_s26 + $0x70] sm:$0xff]   ;;  %v3009_v28 = vld [vmem:[%s4016_s26 + $0x78] sm:$0xff]   ;;  %v596_v31 = vld [vmem:[%s3490_s30 + $0x8] sm:$0xff] }
  0x26   : > { %2749 = vmatprep.subr.bf16.mxu1 %v2991_v10  ;;  %v3006_v25 = vld [vmem:[%s4016_s26 + $0x30] sm:$0xff]   ;;  %v3010_v29 = vld [vmem:[%s4016_s26 + $0x38] sm:$0xff]   ;;  %v603_v32 = vld [vmem:[%s3490_s30 + $0x40] sm:$0xff] }
  0x27   : > { %2722 = vmatpush3.bf16.msra.mxu0 %v2990_v9  ;;  %v3007_v26 = vld [vmem:[%s4016_s26 + $0xf0] sm:$0xff]   ;;  %v3011_v30 = vld [vmem:[%s4016_s26 + $0xf8] sm:$0xff]   ;;  %v624_v33 = vpack.c.bf16 %v603_v32, %v596_v31  ;;  %v595_v35 = vld [vmem:[%s3490_s30] sm:$0xff] }
  0x28   : > { %2723 = vmatprep.subr.bf16.mxu0 %v2993_v12  ;;  %v3008_v27 = vld [vmem:[%s4016_s26 + $0xb0] sm:$0xff]   ;;  %v3012_v34 = vld [vmem:[%s4016_s26 + $0xb8] sm:$0xff]   ;;  %v3013_v38 = vld [vmem:[%s4016_s26 + $0x140] sm:$0xff]  }
  0x29   : > { %2750 = vmatpush3.bf16.msra.mxu1 %v2992_v11  ;;  %v602_v36 = vld [vmem:[%s3490_s30 + $0x38] sm:$0xff]  ;;  %1075 = vmatprep.mubr.bf16.mxu0 %v624_v33  ;;  %v605_v40 = vld [vmem:[%s3490_s30 + $0x50] sm:$0xff]  ;;  %v3014_v42 = vld [vmem:[%s4016_s26 + $0x100] sm:$0xff]   ;;  %s3927_s0 = scalar_lea.hbm %s4020_s23, %s2938_s27 }
  0x2a   : > { %2751 = vmatprep.subr.bf16.mxu1 %v2995_v14  ;;  %v623_v37 = vpack.c.bf16 %v602_v36, %v595_v35  ;;  %v598_v39 = vld [vmem:[%s3490_s30 + $0x18] sm:$0xff]  ;;  %v597_v43 = vld [vmem:[%s3490_s30 + $0x10] sm:$0xff]  ;;  %v604_v44 = vld [vmem:[%s3490_s30 + $0x48] sm:$0xff] }
  0x2b   : > { %2724 = vmatpush3.bf16.msra.mxu0 %v2994_v13  ;;  %v626_v41 = vpack.c.bf16 %v605_v40, %v598_v39  ;;  %v625_v45 = vpack.c.bf16 %v604_v44, %v597_v43  ;;  %v3015_v46 = vld [vmem:[%s4016_s26 + $0x148] sm:$0xff]   ;;  %v3017_v48 = vld [vmem:[%s4016_s26 + $0x150] sm:$0xff]   ;;  %v3019_v50 = vld [vmem:[%s4016_s26 + $0x158] sm:$0xff]  }
  0x2c   : > { %2725 = vmatprep.subr.bf16.mxu0 %v2997_v16  ;;  %v3016_v47 = vld [vmem:[%s4016_s26 + $0x108] sm:$0xff]   ;;  %v3018_v49 = vld [vmem:[%s4016_s26 + $0x110] sm:$0xff]   ;;  %v3020_v51 = vld [vmem:[%s4016_s26 + $0x118] sm:$0xff]  }
  0x2d   : > { %2752 = vmatpush3.bf16.msra.mxu1 %v2996_v15  ;;  %1124 = vmatprep.mubr.bf16.mxu1 %v626_v41  ;;  %v610_v52 = vld [vmem:[%s3490_s30 + $0x78] sm:$0xff]  ;;  %v617_v53 = vld [vmem:[%s3490_s30 + $0xb0] sm:$0xff]  ;;  %v3021_v54 = vld [vmem:[%s4016_s26 + $0x160] sm:$0xff]  }
  0x2e   : > { %2753 = vmatprep.subr.bf16.mxu1 %v2999_v18  ;;  %v631_v55 = vpack.c.bf16 %v617_v53, %v610_v52  ;;  %v609_v56 = vld [vmem:[%s3490_s30 + $0x70] sm:$0xff]  ;;  %v616_v57 = vld [vmem:[%s3490_s30 + $0xa8] sm:$0xff]  ;;  %v3022_v58 = vld [vmem:[%s4016_s26 + $0x120] sm:$0xff]  }
  0x2f   : > { %2726 = vmatpush3.bf16.msra.mxu0 %v2998_v17  ;;  %v630_v59 = vpack.c.bf16 %v616_v57, %v609_v56  ;;  %v612_v60 = vld [vmem:[%s3490_s30 + $0x88] sm:$0xff]  ;;  %v619_v61 = vld [vmem:[%s3490_s30 + $0xc0] sm:$0xff]  ;;  %v618_v0 = vld [vmem:[%s3490_s30 + $0xb8] sm:$0xff] }
  0x30   : > { %2727 = vmatprep.subr.bf16.mxu0 %v3001_v20  ;;  %v611_v62 = vld [vmem:[%s3490_s30 + $0x80] sm:$0xff]  ;;  %v633_v63 = vpack.c.bf16 %v619_v61, %v612_v60  ;;  %v3023_v1 = vld [vmem:[%s4016_s26 + $0x168] sm:$0xff]   ;;  %v3025_v5 = vld [vmem:[%s4016_s26 + $0x170] sm:$0xff]  }
  0x31   : > { %2754 = vmatpush3.bf16.msra.mxu1 %v3000_v19  ;;  %v632_v2 = vpack.c.bf16 %v618_v0, %v611_v62  ;;  %v3027_v3 = vld [vmem:[%s4016_s26 + $0x180] sm:$0xff]   ;;  %v3024_v4 = vld [vmem:[%s4016_s26 + $0x128] sm:$0xff]   ;;  %v601_v9 = vld [vmem:[%s3490_s30 + $0x30] sm:$0xff] }
  0x32   : > { %2755 = vmatprep.subr.bf16.mxu1 %v3003_v22  ;;  %v600_v6 = vld [vmem:[%s3490_s30 + $0x28] sm:$0xff]  ;;  %v607_v7 = vld [vmem:[%s3490_s30 + $0x60] sm:$0xff]  ;;  %v622_v12 = vld [vmem:[%s3490_s30 + $0xd8] sm:$0xff] }
  0x33   : > { %2728 = vmatpush3.bf16.msra.mxu0 %v3002_v21  ;;  %v628_v8 = vpack.c.bf16 %v607_v7, %v600_v6  ;;  %v608_v10 = vld [vmem:[%s3490_s30 + $0x68] sm:$0xff]  ;;  %v615_v11 = vld [vmem:[%s3490_s30 + $0xa0] sm:$0xff]  ;;  %v3026_v13 = vld [vmem:[%s4016_s26 + $0x130] sm:$0xff]  }
  0x34   : > { %2729 = vmatprep.subr.bf16.mxu0 %v3005_v24  ;;  %v629_v14 = vpack.c.bf16 %v608_v10, %v601_v9  ;;  %v636_v15 = vpack.c.bf16 %v622_v12, %v615_v11  ;;  %v3028_v16 = vld [vmem:[%s4016_s26 + $0x178] sm:$0xff]   ;;  %v599_v18 = vld [vmem:[%s3490_s30 + $0x20] sm:$0xff]  ;;  %v621_v21 = vld [vmem:[%s3490_s30 + $0xd0] sm:$0xff] }
  0x35   : > { %2756 = vmatpush3.bf16.msra.mxu1 %v3004_v23  ;;  %v3029_v17 = vld [vmem:[%s4016_s26 + $0x138] sm:$0xff]   ;;  %v613_v24 = vld [vmem:[%s3490_s30 + $0x90] sm:$0xff]  ;;  %v3034_v31 = vld [vmem:[%s3977_s3 + $0x20] sm:$0xff]  }
  0x36   : > { %2757 = vmatprep.subr.bf16.mxu1 %v3007_v26  ;;  %v606_v19 = vld [vmem:[%s3490_s30 + $0x58] sm:$0xff]  ;;  %v3035_v32 = vld [vmem:[%s3977_s3 + $0x28] sm:$0xff]   ;;  %v3036_v33 = vld [vmem:[%s3977_s3 + $0x30] sm:$0xff]  }
  0x37   : > { %2730 = vmatpush3.bf16.msra.mxu0 %v3006_v25  ;;  %v614_v20 = vld [vmem:[%s3490_s30 + $0x98] sm:$0xff]  ;;  %v627_v22 = vpack.c.bf16 %v606_v19, %v599_v18  ;;  %v620_v25 = vld [vmem:[%s3490_s30 + $0xc8] sm:$0xff]  ;;  %v3038_v35 = vld [vmem:[%s3979_s5] sm:$0xff]   ;;  %s2936_s30 = smul.u32 224, %s577_s29 }
  0x38   : > { %2731 = vmatprep.subr.bf16.mxu0 %v3009_v28  ;;  %v635_v23 = vpack.c.bf16 %v621_v21, %v614_v20  ;;  %v634_v26 = vpack.c.bf16 %v620_v25, %v613_v24  ;;  %v3031_v28 = vld [vmem:[%s3977_s3 + $0x8] sm:$0xff]  }
  0x39   : > { %2758 = vmatpush3.bf16.msra.mxu1 %v3008_v27  ;;  %v3030_v27 = vld [vmem:[%s3977_s3] sm:$0xff]   ;;  %v3039_v36 = vld [vmem:[%s3979_s5 + $0x8] sm:$0xff]   ;;  %s3882_s1 = scalar_lea.vmem [#allocation2], %s2936_s30  ;;  %s3191_s30 = scalar_lea.vmem %s3190_s22, 7168 }
  0x3a   : > { %2759 = vmatprep.subr.bf16.mxu1 %v3011_v30  ;;  %v3033_v30 = vld [vmem:[%s3977_s3 + $0x18] sm:$0xff]   ;;  %s2474_s18 = sshll.u32 %s3882_s1, 4  ;;  %s3921_s18 = int_to_ptr.vmem [resolvable:$true] %s2474_s18 }
  0x3b   : > { %2732 = vmatpush3.bf16.msra.mxu0 %v3010_v29  ;;  %v3032_v29 = vld [vmem:[%s3977_s3 + $0x10] sm:$0xff]   ;;  %s3185_s25 = scalar_lea.vmem %s3921_s18, 3584  ;;  %p3192_p0 = scmp.lt.s32.totalorder %s3921_s18, %s3190_s22 }
  0x3c   : > { %2773 = vmatprep.subr.bf16.mxu0 %v3013_v38  ;;  %v2569_v38 = vld [vmem:[%s4018_s2] ss:$0 sm:$0xff]  ;;  %p3186_p11 = scmp.ne.s32.totalorder %s3921_s18, %s3185_s25  ;;  %p3193_p1 = scmp.lt.s32.totalorder %s3191_s30, %s3185_s25 }
  0x3d   : > { %2760 = vmatpush3.bf16.msra.mxu1 %v3012_v34  ;;  %v3037_v34 = vld [vmem:[%s3977_s3 + $0x38] sm:$0xff]  }
  0x3e   : > { %1076 = vmatmul.mubr.bf16.vlgmr.msra.gmra.mrb[0].mxu0 %v623_v37  ;;  %2845 = vmatprep.subr.bf16.mxu1 %v3027_v3  ;;  %p3187_p12 = pnand %p3186_p11, %p3386_p5  ;;  %p3194_p2 = por %p3193_p1, %p3192_p0 }
  0x3f   : > { %2774 = vmatpush3.bf16.msra.mxu0 %v3014_v42  ;;  %1083 = vmatprep.mubr.bf16.mxu0 %v631_v55 }
  0x40   : > { %1125 = vmatmul.mubr.bf16.vlgmr.msra.gmra.mrb[0].mxu1 %v625_v45  ;;  %2775 = vmatprep.subr.bf16.mxu0 %v3015_v46  ;;  %p3188_p13 = pneg %p3187_p12 }
  0x41   : > { %1132 = vmatprep.mubr.bf16.mxu1 %v633_v63  ;;  %2846 = vmatpush3.bf16.msra.mxu1 %v3027_v3 }
  0x42   : > { %2851 = vmatprep.subr.bf16.mxu1 %v3030_v27  ;;  %p3195_p3 = pnand %p3194_p2, %p3188_p13 }
  0x43   : > { %2776 = vmatpush3.bf16.msra.mxu0 %v3016_v47 }
  0x44   : > { %2777 = vmatprep.subr.bf16.mxu0 %v3017_v48 }
  0x46   : > { %1084 = vmatmul.mubr.bf16.gmra.mrb[4].mxu0 %v630_v59 }
  0x47   : > { %2778 = vmatpush3.bf16.msra.mxu0 %v3018_v49  ;;  %1173 = vmatprep.mubr.bf16.mxu0 %v628_v8 }
  0x48   : > { %2779 = vmatprep.subr.bf16.mxu0 %v3019_v50  ;;  %1133 = vmatmul.mubr.bf16.gmra.mrb[4].mxu1 %v632_v2 }
  0x49   : > { %2847 = vmatprep.mubr.msk.bf16.mxu1 %vm1036_vm0, %v629_v14 }
  0x4b   : > { %2780 = vmatpush3.bf16.msra.mxu0 %v3020_v51 }
  0x4c   : > { %2781 = vmatprep.subr.bf16.mxu0 %v3021_v54 }
  0x4f   : > { %2782 = vmatpush3.bf16.msra.mxu0 %v3022_v58 }
  0x50   : > { %2783 = vmatprep.subr.bf16.mxu0 %v3023_v1  ;;  %2848 = vmatmul.mubr.msk.bf16.vlgmr.msra.gmra.mrb[8].mxu1 %vm1036_vm0, %v636_v15 }
  0x51   : > { %2852 = vmatpush3.bf16.msra.mxu1 %v3030_v27 }
  0x52   : > { %2853 = vmatprep.subr.bf16.mxu1 %v3031_v28 }
  0x53   : > { %2784 = vmatpush3.bf16.msra.mxu0 %v3024_v4 }
  0x54   : > { %2785 = vmatprep.subr.bf16.mxu0 %v3025_v5 }
  0x55   : > { %2854 = vmatpush3.bf16.msra.mxu1 %v3031_v28 }
  0x56   : > { %2855 = vmatprep.subr.bf16.mxu1 %v3032_v29 }
  0x57   : > { %2786 = vmatpush3.bf16.msra.mxu0 %v3026_v13 }
  0x58   : > { %2787 = vmatprep.subr.bf16.mxu0 %v3028_v16 }
  0x59   : > { %2856 = vmatpush3.bf16.msra.mxu1 %v3032_v29 }
  0x5a   : > { %2857 = vmatprep.subr.bf16.mxu1 %v3033_v30 }
  0x5b   : > { %2788 = vmatpush3.bf16.msra.mxu0 %v3029_v17 }
  0x5c   : > { %2871 = vmatprep.subr.bf16.mxu0 %v3038_v35 }
  0x5d   : > { %2858 = vmatpush3.bf16.msra.mxu1 %v3033_v30 }
  0x5e   : > { %1174 = vmatmul.mubr.bf16.vlgmr.msra.gmra.mrb[8].mxu0 %v627_v22  ;;  %2859 = vmatprep.subr.bf16.mxu1 %v3034_v31 }
  0x5f   : > { %1181 = vmatprep.mubr.bf16.mxu0 %v635_v23  ;;  %2872 = vmatpush3.bf16.msra.mxu0 %v3038_v35 }
  0x60   : > { %2873 = vmatprep.subr.bf16.mxu0 %v3039_v36 }
  0x61   : > { %2860 = vmatpush3.bf16.msra.mxu1 %v3034_v31 }
  0x62   : > { %2861 = vmatprep.subr.bf16.mxu1 %v3035_v32 }
  0x63   : > { %2874 = vmatpush3.bf16.msra.mxu0 %v3039_v36  ;;  %v3040_v36 = vld [vmem:[%s3979_s5 + $0x10] sm:$0xff]  }
  0x64   : > { %2875 = vmatprep.subr.bf16.mxu0 %v3040_v36 }
  0x65   : > { %2862 = vmatpush3.bf16.msra.mxu1 %v3035_v32 }
  0x66   : > { %1182 = vmatmul.mubr.bf16.gmra.mrb[12].mxu0 %v634_v26  ;;  %2863 = vmatprep.subr.bf16.mxu1 %v3036_v33 }
  0x67   : > { %2876 = vmatpush3.bf16.msra.mxu0 %v3040_v36  ;;  %v3054_v36 = vld [vmem:[%s3989_s15 + $0xc] ss:$28 sps:$4 sm:$0xff]  }
  0x69   : > { %2864 = vmatpush3.bf16.msra.mxu1 %v3036_v33 }
  0x6a   : > { %2865 = vmatprep.subr.bf16.mxu1 %v3037_v34 }
  0x6d   : > { %2866 = vmatpush3.bf16.msra.mxu1 %v3037_v34 }
 0x111   : > { %v2733_v37 = vpop.f32.mrb[0].mxu0 }
 0x112   : > { %v2734_v39 = vpop.f32.mrb[1].mxu0 }
 0x113   : > { %v2735_v40 = vadd.f32 %v2734_v39, %v2733_v37  ;;  %v2736_v41 = vpop.f32.mrb[2].mxu0  ;;  %v2761_v42 = vpop.f32.mrb[0].mxu1  ;;  %v3041_v37 = vld [vmem:[%s3979_s5 + $0x18] sm:$0xff]  }
 0x114   : > { %v2737_v43 = vpop.f32.mrb[3].mxu0  ;;  %v2762_v46 = vpop.f32.mrb[1].mxu1  ;;  %2877 = vmatprep.subr.bf16.mxu0 %v3041_v37 }
 0x115   : > { %v1078_v44 = vadd.f32 %v2735_v40, %v2569_v38  ;;  %v2738_v45 = vadd.f32 %v2737_v43, %v2736_v41  ;;  %v2763_v47 = vadd.f32 %v2762_v46, %v2761_v42  ;;  %v2764_v48 = vpop.f32.mrb[2].mxu1  ;;  %2878 = vmatpush3.bf16.msra.mxu0 %v3041_v37  ;;  %v3057_v37 = vld [vmem:[%s3989_s15 + $0x3c] ss:$28 sps:$4 sm:$0xff]  }
 0x116   : > { %v2765_v50 = vpop.f32.mrb[3].mxu1 }
 0x117   : > { %v1081_v49 = vadd.f32 %v2738_v45, %v2569_v38  ;;  %v1127_v51 = vadd.f32 %v2763_v47, %v1078_v44  ;;  %v2766_v52 = vadd.f32 %v2765_v50, %v2764_v48 }
 0x119   : > { %v1130_v53 = vadd.f32 %v2766_v52, %v1081_v49  ;;  %v2739_v54 = vpop.f32.mrb[4].mxu0 }
 0x11a   : > { %v2740_v55 = vpop.f32.mrb[5].mxu0 }
 0x11b   : > { %v2741_v56 = vadd.f32 %v2740_v55, %v2739_v54  ;;  %v2742_v57 = vpop.f32.mrb[6].mxu0  ;;  %v2767_v58 = vpop.f32.mrb[4].mxu1  ;;  %v3043_v54 = vld [vmem:[%s3981_s7] sm:$0x3f]  }
 0x11c   : > { %v2743_v59 = vpop.f32.mrb[7].mxu0  ;;  %v2768_v60 = vpop.f32.mrb[5].mxu1  ;;  %2933 = vmatprep.subr.msk.bf16.mxu0 %vm1493_vm2, %v3043_v54 }
 0x11d   : > { %v1086_v61 = vadd.f32 %v2741_v56, %v2569_v38  ;;  %v2744_v62 = vadd.f32 %v2743_v59, %v2742_v57  ;;  %v2769_v63 = vadd.f32 %v2768_v60, %v2767_v58  ;;  %v2770_v0 = vpop.f32.mrb[6].mxu1  ;;  %v1495_v56 = vsel %vm1493_vm2, %v3043_v54, 0  ;;  %v2630_v57 = vld [vmem:[%s3980_s6] ss:$0 sm:$0xff] }
 0x11e   : > { %v2771_v1 = vpop.f32.mrb[7].mxu1 }
 0x11f   : > { %v1089_v2 = vadd.f32 %v2744_v62, %v2569_v38  ;;  %v1135_v3 = vadd.f32 %v2769_v63, %v1086_v61  ;;  %v2772_v4 = vadd.f32 %v2771_v1, %v2770_v0  ;;  %v2621_v38 = vld [vmem:[%s3978_s4] ss:$0 sm:$0xff] }
 0x121   : > { %v1138_v5 = vadd.f32 %v2772_v4, %v1089_v2 }
 0x123   : > { %v2849_v6 = vpop.f32.mrb[8].mxu1 }
 0x124   : > { %v1224_v7 = vpop.f32.mrb[9].mxu1 }
 0x125   : > { %v2850_v8 = vpop.f32.mrb[10].mxu1 }
 0x126   : > { %v1227_v9 = vpop.f32.mrb[11].mxu1 }
 0x131   : > { %v2789_v10 = vpop.f32.mrb[8].mxu0 }
 0x132   : > { %v2790_v11 = vpop.f32.mrb[9].mxu0 }
 0x133   : > { %v2791_v12 = vadd.f32 %v2790_v11, %v2789_v10  ;;  %v2792_v13 = vpop.f32.mrb[10].mxu0  ;;  %v3045_v10 = vld [vmem:[%s3987_s13] sm:$0xff]   ;;  %v3046_v11 = vld [vmem:[%s3987_s13 + $0x8] sm:$0xff]  }
 0x134   : > { %v2793_v14 = vpop.f32.mrb[11].mxu0 }
 0x135   : > { %v2794_v15 = vadd.f32 %v2793_v14, %v2792_v13  ;;  %v1176_v16 = vadd.f32 %v2791_v12, %v1127_v51  ;;  %v2637_v12 = vld [vmem:[%s3982_s8] ss:$0 sm:$0xff] }
 0x137   : > { %v1225_v17 = vadd.f32 %v1224_v7, %v1176_v16  ;;  %v1179_v18 = vadd.f32 %v2794_v15, %v1130_v53  ;;  %v3042_v53 = vld [vmem:[%s3983_s9] sm:$0x3f]  }
 0x138   : > { %2934 = vmatprep.subr.msk.bf16.mxu1 %vm1493_vm2, %v3042_v53  ;;  %v1566_v55 = vsel %vm1493_vm2, %v3042_v53, 0  ;;  %v2641_v15 = vld [vmem:[%s3984_s10] ss:$0 sm:$0xff] }
 0x139   : > { %v1228_v19 = vadd.f32 %v1227_v9, %v1179_v18  ;;  %v2795_v20 = vpop.f32.mrb[12].mxu0  ;;  %v1239_v22 = vmax.f32 %v1225_v17, 0.0 }
 0x13a   : > { %v2796_v21 = vpop.f32.mrb[13].mxu0 }
 0x13b   : > { %v1240_v23 = vmax.f32 %v1228_v19, 0.0  ;;  %v2797_v24 = vadd.f32 %v2796_v21, %v2795_v20  ;;  %v2798_v25 = vpop.f32.mrb[14].mxu0 }
 0x13c   : > { %v2799_v26 = vpop.f32.mrb[15].mxu0 }
 0x13d   : > { %v1243_v27 = vpack.c.bf16 %v1240_v23, %v1239_v22  ;;  %v1184_v28 = vadd.f32 %v2797_v24, %v1135_v3  ;;  %v2800_v29 = vadd.f32 %v2799_v26, %v2798_v25 }
 0x13f   : > { %v1233_v30 = vadd.f32 %v2849_v6, %v1184_v28  ;;  %v1187_v31 = vadd.f32 %v2800_v29, %v1138_v5  ;;  %2867 = vmatprep.mubr.bf16.mxu1 %v1243_v27 }
 0x141   : > { %v1236_v32 = vadd.f32 %v2850_v8, %v1187_v31  ;;  %v1241_v33 = vmax.f32 %v1233_v30, 0.0  ;;  %v3044_v8 = vld [vmem:[%s3985_s11] sm:$0x3f]  }
 0x142   : > { %v1640_v9 = vsel %vm1493_vm2, %v3044_v8, 0 }
 0x143   : > { %v1242_v34 = vmax.f32 %v1236_v32, 0.0  ;;  %v3047_v32 = vld [vmem:[%s3987_s13 + $0x10] sm:$0xff]  }
 0x145   : > { %v1244_v35 = vpack.c.bf16 %v1242_v34, %v1241_v33  ;;  %v3048_v33 = vld [vmem:[%s3987_s13 + $0x18] sm:$0xff]  }
 0x146   : > { %v3049_v34 = vld [vmem:[%s3989_s15] ss:$28 sps:$4 sm:$0xff]  }
 0x147   : > { %2868 = vmatmul.mubr.bf16.vlgmr.msra.gmra.mrb[12].mxu1 %v1244_v35  ;;  %v3051_v35 = vld [vmem:[%s3989_s15 + $0x4] ss:$28 sps:$4 sm:$0xff]  }
 0x148   : > { %2890 = vmatpush3.bf16.msra.mxu1 %v1566_v55 }
 0x149   : > { %2901 = vmatprep.subr.bf16.mxu1 %v3045_v10 }
 0x21a   : > { %v2869_v39 = vpop.f32.mrb[12].mxu1 }
 0x21b   : > { %v1359_v40 = vadd.f32 %v2869_v39, %v2621_v38  ;;  %v1350_v41 = vpop.f32.mrb[13].mxu1  ;;  %v3063_v39 = vld [vmem:[%s3989_s15 + $0x74] ss:$28 sps:$4 sm:$0xff]  }
 0x21c   : > { %v1351_v42 = vadd.f32 %v2621_v38, %v1350_v41  ;;  %v2870_v43 = vpop.f32.mrb[14].mxu1  ;;  %v3069_v41 = vld [vmem:[%s3989_s15 + $0xac] ss:$28 sps:$4 sm:$0xff]  }
 0x21d   : > { %v1362_v44 = vadd.f32 %v2870_v43, %v2621_v38  ;;  %v1353_v45 = vpop.f32.mrb[15].mxu1  ;;  %v1367_v47 = vmax.f32 %v1359_v40, 0.0  ;;  %v3061_v40 = vld [vmem:[%s3989_s15 + $0x70] ss:$28 sps:$4 sm:$0xff]   ;;  %v3075_v43 = vld [vmem:[%s3989_s15 + $0xe4] ss:$28 sps:$4 sm:$0xff]  }
 0x21e   : > { %v1354_v46 = vadd.f32 %v2621_v38, %v1353_v45  ;;  %v1365_v49 = vmax.f32 %v1351_v42, 0.0  ;;  %v3055_v38 = vld [vmem:[%s3989_s15 + $0x38] ss:$28 sps:$4 sm:$0xff]   ;;  %v3067_v42 = vld [vmem:[%s3989_s15 + $0xa8] ss:$28 sps:$4 sm:$0xff]  }
 0x21f   : > { %v1368_v48 = vmax.f32 %v1362_v44, 0.0  ;;  %v3073_v44 = vld [vmem:[%s3989_s15 + $0xe0] ss:$28 sps:$4 sm:$0xff]  }
 0x220   : > { %v1366_v50 = vmax.f32 %v1354_v46, 0.0  ;;  %v3081_v45 = vld [vmem:[%s3989_s15 + $0x11c] ss:$28 sps:$4 sm:$0xff]  }
 0x221   : > { %v1370_v51 = vpack.c.bf16 %v1368_v48, %v1367_v47  ;;  %v3079_v46 = vld [vmem:[%s3989_s15 + $0x118] ss:$28 sps:$4 sm:$0xff]   ;;  %v2645_v47 = vld [vmem:[%s3986_s12] ss:$0 sm:$0xff] }
 0x222   : > { %v1369_v52 = vpack.c.bf16 %v1366_v50, %v1365_v49 }
 0x224   : > { %2879 = vmatprep.mubr.msk.bf16.mxu0 %vm1410_vm1, %v1369_v52 }
 0x225   : > { %2880 = vmatmul.mubr.msk.bf16.vlgmr.msra.gmra.mrb[16].mxu0 %vm1410_vm1, %v1370_v51 }
 0x226   : > { %2884 = vmatpush3.bf16.msra.mxu0 %v1495_v56 }
 0x227   : > { %2935 = vmatprep.subr.msk.bf16.mxu0 %vm1493_vm2, %v3044_v8  ;;  %v3082_v8 = vld [vmem:[%s3989_s15 + $0x120] ss:$28 sps:$4 sm:$0xff]  }
 0x2f8   : > { %v2881_v58 = vpop.f32.mrb[16].mxu0 }
 0x2f9   : > { %v1460_v59 = vadd.f32 %v2881_v58, %v2630_v57  ;;  %v1451_v60 = vpop.f32.mrb[17].mxu0 }
 0x2fa   : > { %v1452_v61 = vadd.f32 %v2630_v57, %v1451_v60  ;;  %v2882_v62 = vpop.f32.mrb[18].mxu0 }
 0x2fb   : > { %v1463_v63 = vadd.f32 %v2882_v62, %v2630_v57  ;;  %v1454_v0 = vpop.f32.mrb[19].mxu0  ;;  %v1468_v2 = vmax.f32 %v1460_v59, 0.0  ;;  %v3052_v62 = vld [vmem:[%s3989_s15 + $0x8] ss:$28 sps:$4 sm:$0xff]  }
 0x2fc   : > { %v1455_v1 = vadd.f32 %v2630_v57, %v1454_v0  ;;  %v1466_v4 = vmax.f32 %v1452_v61, 0.0  ;;  %v3058_v0 = vld [vmem:[%s3989_s15 + $0x40] ss:$28 sps:$4 sm:$0xff]  }
 0x2fd   : > { %v1469_v3 = vmax.f32 %v1463_v63, 0.0  ;;  %v3060_v63 = vld [vmem:[%s3989_s15 + $0x44] ss:$28 sps:$4 sm:$0xff]  }
 0x2fe   : > { %v1467_v5 = vmax.f32 %v1455_v1, 0.0  ;;  %v3066_v1 = vld [vmem:[%s3989_s15 + $0x7c] ss:$28 sps:$4 sm:$0xff]  }
 0x2ff   : > { %v1471_v6 = vpack.c.bf16 %v1469_v3, %v1468_v2  ;;  %v3064_v2 = vld [vmem:[%s3989_s15 + $0x78] ss:$28 sps:$4 sm:$0xff]  }
 0x300   : > { %v1470_v7 = vpack.c.bf16 %v1467_v5, %v1466_v4  ;;  %v3072_v3 = vld [vmem:[%s3989_s15 + $0xb4] ss:$28 sps:$4 sm:$0xff]   ;;  %v3078_v5 = vld [vmem:[%s3989_s15 + $0xec] ss:$28 sps:$4 sm:$0xff]  }
 0x301   : > { %v3070_v4 = vld [vmem:[%s3989_s15 + $0xb0] ss:$28 sps:$4 sm:$0xff]  }
 0x302   : > { %2885 = vmatprep.mubr.msk.bf16.mxu0 %vm1486_vm3, %v1470_v7  ;;  %2891 = vmatprep.mubr.msk.bf16.mxu1 %vm1486_vm3, %v1470_v7  ;;  %v3084_v7 = vld [vmem:[%s3989_s15 + $0x124] ss:$28 sps:$4 sm:$0xff]  }
 0x303   : > { %2886 = vmatmul.mubr.msk.bf16.vlgmr.msra.gmra.mrb[20].mxu0 %vm1486_vm3, %v1471_v6  ;;  %2892 = vmatmul.mubr.msk.bf16.vlgmr.msra.gmra.mrb[16].mxu1 %vm1486_vm3, %v1471_v6  ;;  %v3076_v6 = vld [vmem:[%s3989_s15 + $0xe8] ss:$28 sps:$4 sm:$0xff]  }
 0x304   : > { %2896 = vmatpush3.bf16.msra.mxu0 %v1640_v9  ;;  %2902 = vmatpush3.bf16.msra.mxu1 %v3045_v10  ;;  %v3087_v9 = vld [vmem:[%s3989_s15 + $0x154] ss:$28 sps:$4 sm:$0xff]   ;;  %v3090_v10 = vld [vmem:[%s3989_s15 + $0x15c] ss:$28 sps:$4 sm:$0xff]  }
 0x305   : > { %2903 = vmatprep.subr.bf16.mxu1 %v3046_v11  ;;  %2186 = vmatprep.subr.bf16.mxu0 %v3051_v35 }
 0x308   : > { %2904 = vmatpush3.bf16.msra.mxu1 %v3046_v11  ;;  %v3085_v11 = vld [vmem:[%s3989_s15 + $0x150] ss:$28 sps:$4 sm:$0xff]  }
 0x309   : > { %2905 = vmatprep.subr.bf16.mxu1 %v3047_v32 }
 0x30c   : > { %2906 = vmatpush3.bf16.msra.mxu1 %v3047_v32 }
 0x30d   : > { %2907 = vmatprep.subr.bf16.mxu1 %v3048_v33 }
 0x310   : > { %2908 = vmatpush3.bf16.msra.mxu1 %v3048_v33 }
 0x311   : > { %2239 = vmatprep.subr.bf16.mxu1 %v3054_v36  ;;  %v3103_v36 = vld [vmem:[%s3989_s15 + $0x4c] ss:$28 sps:$4 sm:$0xff]  }
 0x3d6   : > { %v2887_v13 = vpop.f32.mrb[20].mxu0  ;;  %v2893_v14 = vpop.f32.mrb[16].mxu1 }
 0x3d7   : > { %v1531_v16 = vpop.f32.mrb[21].mxu0  ;;  %v1602_v17 = vpop.f32.mrb[17].mxu1  ;;  %v1611_v21 = vadd.f32 %v2893_v14, %v2641_v15  ;;  %v1540_v28 = vadd.f32 %v2887_v13, %v2637_v12  ;;  %v3093_v13 = vld [vmem:[%s3989_s15 + $0x18c] ss:$28 sps:$4 sm:$0xff]   ;;  %v3096_v14 = vld [vmem:[%s3989_s15 + $0x194] ss:$28 sps:$4 sm:$0xff]  }
 0x3d8   : > { %v1532_v18 = vadd.f32 %v2637_v12, %v1531_v16  ;;  %v2888_v19 = vpop.f32.mrb[22].mxu0  ;;  %v2894_v20 = vpop.f32.mrb[18].mxu1  ;;  %v1603_v25 = vadd.f32 %v2641_v15, %v1602_v17  ;;  %v3094_v16 = vld [vmem:[%s3989_s15 + $0x190] ss:$28 sps:$4 sm:$0xff]  }
 0x3d9   : > { %v1614_v22 = vadd.f32 %v2894_v20, %v2641_v15  ;;  %v1534_v23 = vpop.f32.mrb[23].mxu0  ;;  %v1605_v24 = vpop.f32.mrb[19].mxu1  ;;  %v1543_v30 = vadd.f32 %v2888_v19, %v2637_v12  ;;  %1549 = vst.msk [vmem:[%s591_s20 + $0x10] sm:$0xff] %vm1546_vm4, %v1540_v28  ;;  %v3099_v17 = vld [vmem:[%s3989_s15 + $0x14] ss:$28 sps:$4 sm:$0xff]  }
 0x3da   : > { %1547 = vst.msk [vmem:[%s591_s20] sm:$0xff] %vm1546_vm4, %v1532_v18  ;;  %v1535_v26 = vadd.f32 %v2637_v12, %v1534_v23  ;;  %v1606_v27 = vadd.f32 %v2641_v15, %v1605_v24  ;;  %v3088_v12 = vld [vmem:[%s3989_s15 + $0x158] ss:$28 sps:$4 sm:$0xff]   ;;  %v3091_v15 = vld [vmem:[%s3989_s15 + $0x188] ss:$28 sps:$4 sm:$0xff]   ;;  %v3249_v18 = vmov 0  }
 0x3db   : > { %v1618_v29 = vpack.c.bf16 %v1614_v22, %v1611_v21  ;;  %1550 = vst.msk [vmem:[%s591_s20 + $0x18] sm:$0xff] %vm1546_vm4, %v1543_v30  ;;  %v3100_v19 = vld [vmem:[%s3989_s15 + $0x18] ss:$28 sps:$4 sm:$0xff]   ;;  %v2649_v20 = vld [vmem:[%s3988_s14] ss:$0 sm:$0xff] }
 0x3dc   : > { %1548 = vst.msk [vmem:[%s591_s20 + $0x8] sm:$0xff] %vm1546_vm4, %v1535_v26  ;;  %v1617_v31 = vpack.c.bf16 %v1606_v27, %v1603_v25 }
 0x3de   : > { %2897 = vmatprep.mubr.msk.bf16.mxu0 %vm1486_vm3, %v1617_v31 }
 0x3df   : > { %2898 = vmatmul.mubr.msk.bf16.vlgmr.msra.gmra.mrb[24].mxu0 %vm1486_vm3, %v1618_v29 }
 0x3e0   : > { %2187 = vmatpush1.bf16.msra.mxu0 %v3049_v34  ;;  %2218 = vmatprep.mubr.bf16.mxu0 %v3249_v18  ;;  %v3097_v34 = vld [vmem:[%s3989_s15 + $0x10] ss:$28 sps:$4 sm:$0xff]  }
 0x3e1   : > { %2188 = vmatprep.subr.bf16.mxu0 %v3057_v37  ;;  %v3104_v37 = vld [vmem:[%s3989_s15 + $0x50] ss:$28 sps:$4 sm:$0xff]  }
 0x3e4   : > { %2189 = vmatpush1.bf16.msra.mxu0 %v3055_v38  ;;  %v3101_v38 = vld [vmem:[%s3989_s15 + $0x48] ss:$28 sps:$4 sm:$0xff]  }
 0x3e5   : > { %2190 = vmatprep.subr.bf16.mxu0 %v3063_v39  ;;  %v3107_v39 = vld [vmem:[%s3989_s15 + $0x84] ss:$28 sps:$4 sm:$0xff]  }
 0x3e8   : > { %2191 = vmatpush1.bf16.msra.mxu0 %v3061_v40  ;;  %v3108_v40 = vld [vmem:[%s3989_s15 + $0x88] ss:$28 sps:$4 sm:$0xff]  }
 0x3e9   : > { %2192 = vmatprep.subr.bf16.mxu0 %v3069_v41  ;;  %v3105_v41 = vld [vmem:[%s3989_s15 + $0x80] ss:$28 sps:$4 sm:$0xff]  }
 0x3ec   : > { %2193 = vmatpush1.bf16.msra.mxu0 %v3067_v42  ;;  %v3111_v42 = vld [vmem:[%s3989_s15 + $0xbc] ss:$28 sps:$4 sm:$0xff]  }
 0x3ed   : > { %2194 = vmatprep.subr.bf16.mxu0 %v3075_v43  ;;  %v3112_v43 = vld [vmem:[%s3989_s15 + $0xc0] ss:$28 sps:$4 sm:$0xff]  }
 0x3f0   : > { %2195 = vmatpush1.bf16.msra.mxu0 %v3073_v44  ;;  %v3109_v44 = vld [vmem:[%s3989_s15 + $0xb8] ss:$28 sps:$4 sm:$0xff]  }
 0x3f1   : > { %2196 = vmatprep.subr.bf16.mxu0 %v3081_v45  ;;  %v3115_v45 = vld [vmem:[%s3989_s15 + $0xf4] ss:$28 sps:$4 sm:$0xff]  }
 0x3f4   : > { %2197 = vmatpush1.bf16.msra.mxu0 %v3079_v46  ;;  %v3116_v46 = vld [vmem:[%s3989_s15 + $0xf8] ss:$28 sps:$4 sm:$0xff]  }
 0x3f5   : > { %2198 = vmatprep.subr.bf16.mxu0 %v3087_v9 }
 0x3f8   : > { %2199 = vmatpush1.bf16.msra.mxu0 %v3085_v11 }
 0x3f9   : > { %2200 = vmatprep.subr.bf16.mxu0 %v3093_v13 }
 0x3fc   : > { %2201 = vmatpush1.bf16.msra.mxu0 %v3091_v15 }
 0x3fd   : > { %2292 = vmatprep.subr.bf16.mxu0 %v3099_v17 }
 0x4b2   : > { %v2899_v48 = vpop.f32.mrb[24].mxu0 }
 0x4b3   : > { %v1685_v49 = vadd.f32 %v2899_v48, %v2645_v47  ;;  %v1676_v50 = vpop.f32.mrb[25].mxu0  ;;  %v3119_v48 = vld [vmem:[%s3989_s15 + $0x12c] ss:$28 sps:$4 sm:$0xff]  }
 0x4b4   : > { %v1677_v51 = vadd.f32 %v2645_v47, %v1676_v50  ;;  %v2900_v52 = vpop.f32.mrb[26].mxu0  ;;  %v3117_v50 = vld [vmem:[%s3989_s15 + $0x128] ss:$28 sps:$4 sm:$0xff]  }
 0x4b5   : > { %v1688_v53 = vadd.f32 %v2900_v52, %v2645_v47  ;;  %v1679_v54 = vpop.f32.mrb[27].mxu0  ;;  %v1693_v56 = vmax.f32 %v1685_v49, 0.0  ;;  %v3120_v49 = vld [vmem:[%s3989_s15 + $0x130] ss:$28 sps:$4 sm:$0xff]   ;;  %v3124_v52 = vld [vmem:[%s3989_s15 + $0x168] ss:$28 sps:$4 sm:$0xff]  }
 0x4b6   : > { %v1680_v55 = vadd.f32 %v2645_v47, %v1679_v54  ;;  %v1691_v58 = vmax.f32 %v1677_v51, 0.0  ;;  %v3113_v47 = vld [vmem:[%s3989_s15 + $0xf0] ss:$28 sps:$4 sm:$0xff]   ;;  %v3123_v51 = vld [vmem:[%s3989_s15 + $0x164] ss:$28 sps:$4 sm:$0xff]  }
 0x4b7   : > { %v1694_v57 = vmax.f32 %v1688_v53, 0.0  ;;  %v3121_v53 = vld [vmem:[%s3989_s15 + $0x160] ss:$28 sps:$4 sm:$0xff]  }
 0x4b8   : > { %v1692_v59 = vmax.f32 %v1680_v55, 0.0  ;;  %v3127_v54 = vld [vmem:[%s3989_s15 + $0x19c] ss:$28 sps:$4 sm:$0xff]  }
 0x4b9   : > { %v1696_v60 = vpack.c.bf16 %v1694_v57, %v1693_v56  ;;  %v3128_v55 = vld [vmem:[%s3989_s15 + $0x1a0] ss:$28 sps:$4 sm:$0xff]   ;;  %v3125_v56 = vld [vmem:[%s3989_s15 + $0x198] ss:$28 sps:$4 sm:$0xff]   ;;  %v1863_v57 = vlaneseq }
 0x4ba   : > { %v1695_v61 = vpack.c.bf16 %v1692_v59, %v1691_v58 }
 0x4bb   : > { %v3864_v58 = vshrl.u32 %v1863_v57, 7 }
 0x4bc   : > { %2909 = vmatprep.mubr.msk.bf16.mxu1 %vm1410_vm1, %v1695_v61  ;;  %v3871_v61 = vld [vmem:[%s3990_s16] sm:$0x7f] }
 0x4bd   : > { %2910 = vmatmul.mubr.msk.bf16.vlgmr.msra.gmra.mrb[20].mxu1 %vm1410_vm1, %v1696_v60  ;;  %v1865_v59 = vsub.s32 0, %v3864_v58  ;;  %v1873_v60 = vsub.s32 2, %v3864_v58 }
 0x4be   : > { %2240 = vmatpush1.bf16.msra.mxu1 %v3052_v62  ;;  %2271 = vmatprep.mubr.bf16.mxu1 %v3249_v18  ;;  %v1869_v62 = vsub.s32 1, %v3864_v58 }
 0x4bf   : > { %2241 = vmatprep.subr.bf16.mxu1 %v3060_v63  ;;  %v1877_v63 = vsub.s32 3, %v3864_v58 }
 0x4c2   : > { %2242 = vmatpush1.bf16.msra.mxu1 %v3058_v0  ;;  %v1866_v0 = vrot.slane %v3871_v61, %v1865_v59 }
 0x4c3   : > { %2243 = vmatprep.subr.bf16.mxu1 %v3066_v1  ;;  %v1874_v1 = vrot.slane %v3871_v61, %v1873_v60 }
 0x4c6   : > { %2244 = vmatpush1.bf16.msra.mxu1 %v3064_v2  ;;  %v1870_v2 = vrot.slane %v3871_v61, %v1869_v62 }
 0x4c7   : > { %2245 = vmatprep.subr.bf16.mxu1 %v3072_v3  ;;  %v1878_v3 = vrot.slane %v3871_v61, %v1877_v63 }
 0x4ca   : > { %2246 = vmatpush1.bf16.msra.mxu1 %v3070_v4 }
 0x4cb   : > { %2247 = vmatprep.subr.bf16.mxu1 %v3078_v5 }
 0x4ce   : > { %2248 = vmatpush1.bf16.msra.mxu1 %v3076_v6 }
 0x4cf   : > { %2249 = vmatprep.subr.bf16.mxu1 %v3084_v7 }
 0x4d2   : > { %2250 = vmatpush1.bf16.msra.mxu1 %v3082_v8 }
 0x4d3   : > { %2251 = vmatprep.subr.bf16.mxu1 %v3090_v10 }
 0x4d6   : > { %2252 = vmatpush1.bf16.msra.mxu1 %v3088_v12 }
 0x4d7   : > { %2253 = vmatprep.subr.bf16.mxu1 %v3096_v14 }
 0x4da   : > { %2254 = vmatpush1.bf16.msra.mxu1 %v3094_v16 }
 0x4db   : > { %2913 = vmatprep.subr.bf16.mxu1 %v3100_v19 }
 0x590   : > { %v2911_v21 = vpop.f32.mrb[20].mxu1 }
 0x591   : > { %v1785_v22 = vadd.f32 %v2911_v21, %v2649_v20  ;;  %v1776_v23 = vpop.f32.mrb[21].mxu1 }
 0x592   : > { %v1777_v24 = vadd.f32 %v2649_v20, %v1776_v23  ;;  %v2912_v25 = vpop.f32.mrb[22].mxu1 }
 0x593   : > { %v1788_v26 = vadd.f32 %v2912_v25, %v2649_v20  ;;  %v1779_v27 = vpop.f32.mrb[23].mxu1  ;;  %v1793_v29 = vmax.f32 %v1785_v22, 0.0 }
 0x594   : > { %v1780_v28 = vadd.f32 %v2649_v20, %v1779_v27  ;;  %v1791_v31 = vmax.f32 %v1777_v24, 0.0 }
 0x595   : > { %v1794_v30 = vmax.f32 %v1788_v26, 0.0 }
 0x596   : > { %v1792_v32 = vmax.f32 %v1780_v28, 0.0 }
 0x597   : > { %v3788_v33 = vpack.c.bf16 %v1794_v30, %v1793_v29 }
 0x598   : > { %v1795_v35 = vpack.c.bf16 %v1792_v32, %v1791_v31 }
 0x59a   : > { %2219 = vmatmul.mubr.bf16.vlgmr.msra.gmra.mrb[28].mxu0 %v1795_v35  ;;  %2272 = vmatmul.mubr.bf16.vlgmr.msra.gmra.mrb[24].mxu1 %v1795_v35 }
 0x59b   : > { %2293 = vmatpush1.bf16.msra.mxu0 %v3097_v34  ;;  %2914 = vmatpush3.bf16.msra.mxu1 %v3100_v19 }
 0x59c   : > { %2294 = vmatprep.subr.bf16.mxu0 %v3103_v36  ;;  %2915 = vmatprep.subr.bf16.mxu1 %v3104_v37 }
 0x59d   : > { %2228 = vmatprep.mubr.bf16.mxu0 %v3249_v18  ;;  %2281 = vmatprep.mubr.bf16.mxu1 %v3249_v18 }
 0x59f   : > { %2295 = vmatpush1.bf16.msra.mxu0 %v3101_v38  ;;  %2916 = vmatpush3.bf16.msra.mxu1 %v3104_v37 }
 0x5a0   : > { %2296 = vmatprep.subr.bf16.mxu0 %v3107_v39  ;;  %2917 = vmatprep.subr.bf16.mxu1 %v3108_v40 }
 0x5a2   : > { %2229 = vmatmul.mubr.bf16.gmra.mrb[32].mxu0 %v3788_v33  ;;  %2282 = vmatmul.mubr.bf16.gmra.mrb[28].mxu1 %v3788_v33 }
 0x5a3   : > { %2297 = vmatpush1.bf16.msra.mxu0 %v3105_v41  ;;  %2918 = vmatpush3.bf16.msra.mxu1 %v3108_v40 }
 0x5a4   : > { %2929 = vmatprep.mubr.bf16.mxu1 %v1795_v35  ;;  %2298 = vmatprep.subr.bf16.mxu0 %v3111_v42 }
 0x5a5   : > { %2919 = vmatprep.subr.bf16.mxu1 %v3112_v43  ;;  %2324 = vmatprep.mubr.bf16.mxu0 %v3249_v18 }
 0x5a7   : > { %2299 = vmatpush1.bf16.msra.mxu0 %v3109_v44  ;;  %2920 = vmatpush3.bf16.msra.mxu1 %v3112_v43 }
 0x5a8   : > { %2300 = vmatprep.subr.bf16.mxu0 %v3115_v45  ;;  %2921 = vmatprep.subr.bf16.mxu1 %v3116_v46 }
 0x5ab   : > { %2301 = vmatpush1.bf16.msra.mxu0 %v3113_v47  ;;  %2922 = vmatpush3.bf16.msra.mxu1 %v3116_v46 }
 0x5ac   : > { %2302 = vmatprep.subr.bf16.mxu0 %v3119_v48  ;;  %2923 = vmatprep.subr.bf16.mxu1 %v3120_v49 }
 0x5af   : > { %2303 = vmatpush1.bf16.msra.mxu0 %v3117_v50  ;;  %2924 = vmatpush3.bf16.msra.mxu1 %v3120_v49  ;;  %v1881_v49 = vsub.s32 4, %v3864_v58  ;;  %v1889_v50 = vsub.s32 6, %v3864_v58 }
 0x5b0   : > { %2304 = vmatprep.subr.bf16.mxu0 %v3123_v51  ;;  %2925 = vmatprep.subr.bf16.mxu1 %v3124_v52 }
 0x5b3   : > { %2305 = vmatpush1.bf16.msra.mxu0 %v3121_v53  ;;  %2926 = vmatpush3.bf16.msra.mxu1 %v3124_v52  ;;  %v1885_v52 = vsub.s32 5, %v3864_v58 }
 0x5b4   : > { %2306 = vmatprep.subr.bf16.mxu0 %v3127_v54  ;;  %2927 = vmatprep.subr.bf16.mxu1 %v3128_v55 }
 0x5b5   : > { %v1886_v57 = vrot.slane %v3871_v61, %v1885_v52 }
 0x5b7   : > { %2307 = vmatpush1.bf16.msra.mxu0 %v3125_v56  ;;  %2928 = vmatpush3.bf16.msra.mxu1 %v3128_v55  ;;  %v1882_v55 = vrot.slane %v3871_v61, %v1881_v49  ;;  %v1890_v56 = vrot.slane %v3871_v61, %v1889_v50 }
 0x5ba   : > { %2325 = vmatmul.mubr.bf16.vlgmr.msra.gmra.mrb[36].mxu0 %v1795_v35  ;;  %2930 = vmatmul.mubr.bf16.vlgmr.msra.gmra.mrb[32].mxu1 %v3788_v33 }
 0x5bb   : > { %2334 = vmatprep.mubr.bf16.mxu0 %v3249_v18 }
 0x5c2   : > { %2335 = vmatmul.mubr.bf16.gmra.mrb[40].mxu0 %v3788_v33 }
 0x66d   : > { %v2220_v4 = vpop.f32.mrb[28].mxu0  ;;  %v2273_v5 = vpop.f32.mrb[24].mxu1 }
 0x66e   : > { %v2221_v6 = vadd.f32 %v2220_v4, %v1866_v0  ;;  %v2274_v7 = vadd.f32 %v2273_v5, %v1874_v1  ;;  %v2222_v8 = vpop.f32.mrb[29].mxu0  ;;  %v2275_v9 = vpop.f32.mrb[25].mxu1 }
 0x66f   : > { %v2223_v10 = vadd.f32 %v2222_v8, %v1870_v2  ;;  %v2276_v11 = vadd.f32 %v2275_v9, %v1878_v3  ;;  %v2224_v12 = vpop.f32.mrb[30].mxu0  ;;  %v2277_v13 = vpop.f32.mrb[26].mxu1 }
 0x670   : > { %3129 = vtanh.f32 %v2221_v6  ;;  %v2225_v14 = vadd.f32 %v2224_v12, %v1866_v0  ;;  %v2226_v15 = vpop.f32.mrb[31].mxu0  ;;  %v2279_v16 = vpop.f32.mrb[27].mxu1  ;;  %v2278_v17 = vadd.f32 %v2277_v13, %v1874_v1 }
 0x671   : > { %3131 = vtanh.f32 %v2274_v7  ;;  %v2227_v18 = vadd.f32 %v2226_v15, %v1870_v2  ;;  %v2280_v19 = vadd.f32 %v2279_v16, %v1878_v3 }
 0x672   : > { %3133 = vtanh.f32 %v2223_v10 }
 0x673   : > { %3135 = vtanh.f32 %v2276_v11 }
 0x674   : > { %3137 = vtanh.f32 %v2225_v14 }
 0x675   : > { %3139 = vtanh.f32 %v2278_v17  ;;  %v2230_v20 = vpop.f32.mrb[32].mxu0  ;;  %v2283_v21 = vpop.f32.mrb[28].mxu1 }
 0x676   : > { %3141 = vtanh.f32 %v2227_v18  ;;  %v2231_v22 = vadd.f32 %v2230_v20, %v1866_v0  ;;  %v2284_v23 = vadd.f32 %v2283_v21, %v1874_v1  ;;  %v2232_v24 = vpop.f32.mrb[33].mxu0  ;;  %v2285_v25 = vpop.f32.mrb[29].mxu1 }
 0x677   : > { %3143 = vtanh.f32 %v2280_v19  ;;  %v2233_v26 = vadd.f32 %v2232_v24, %v1870_v2  ;;  %v2286_v27 = vadd.f32 %v2285_v25, %v1878_v3  ;;  %v2234_v28 = vpop.f32.mrb[34].mxu0  ;;  %v2287_v29 = vpop.f32.mrb[30].mxu1 }
 0x678   : > { %3145 = vtanh.f32 %v2231_v22  ;;  %v2235_v30 = vadd.f32 %v2234_v28, %v1866_v0  ;;  %v2236_v31 = vpop.f32.mrb[35].mxu0  ;;  %v2289_v32 = vpop.f32.mrb[31].mxu1  ;;  %v2288_v33 = vadd.f32 %v2287_v29, %v1874_v1 }
 0x679   : > { %3147 = vtanh.f32 %v2284_v23  ;;  %v2237_v35 = vadd.f32 %v2236_v31, %v1870_v2  ;;  %v2290_v37 = vadd.f32 %v2289_v32, %v1878_v3 }
 0x67a   : > { %v3130_v34 = vpop.eup %3129  ;;  %3149 = vtanh.f32 %v2233_v26 }
 0x67b   : > { %v3132_v36 = vpop.eup %3131  ;;  %2422 = vst [vmem:[%s3882_s1] sm:$0xff] %v3130_v34  ;;  %3151 = vtanh.f32 %v2286_v27 }
 0x67c   : > { %v3134_v38 = vpop.eup %3133  ;;  %2424 = vst [vmem:[%s3882_s1 + $0x10] sm:$0xff] %v3132_v36  ;;  %3153 = vtanh.f32 %v2235_v30 }
 0x67d   : > { %v3136_v39 = vpop.eup %3135  ;;  %2423 = vst [vmem:[%s3882_s1 + $0x8] sm:$0xff] %v3134_v38  ;;  %3155 = vtanh.f32 %v2288_v33 }
 0x67e   : > { %v3138_v40 = vpop.eup %3137  ;;  %2425 = vst [vmem:[%s3882_s1 + $0x18] sm:$0xff] %v3136_v39  ;;  %3157 = vtanh.f32 %v2237_v35 }
 0x67f   : > { %v3140_v41 = vpop.eup %3139  ;;  %2429 = vst [vmem:[%s3882_s1 + $0x38] sm:$0xff] %v3138_v40  ;;  %3159 = vtanh.f32 %v2290_v37 }
 0x680   : > { %v3142_v42 = vpop.eup %3141  ;;  %2431 = vst [vmem:[%s3882_s1 + $0x48] sm:$0xff] %v3140_v41 }
 0x681   : > { %v3144_v43 = vpop.eup %3143  ;;  %2430 = vst [vmem:[%s3882_s1 + $0x40] sm:$0xff] %v3142_v42 }
 0x682   : > { %v3146_v44 = vpop.eup %3145  ;;  %2432 = vst [vmem:[%s3882_s1 + $0x50] sm:$0xff] %v3144_v43 }
 0x683   : > { %v3148_v45 = vpop.eup %3147  ;;  %2436 = vst [vmem:[%s3882_s1 + $0x70] sm:$0xff] %v3146_v44 }
 0x684   : > { %v3150_v46 = vpop.eup %3149  ;;  %2438 = vst [vmem:[%s3882_s1 + $0x80] sm:$0xff] %v3148_v45 }
 0x685   : > { %v3152_v47 = vpop.eup %3151  ;;  %2437 = vst [vmem:[%s3882_s1 + $0x78] sm:$0xff] %v3150_v46 }
 0x686   : > { %v3154_v48 = vpop.eup %3153  ;;  %2439 = vst [vmem:[%s3882_s1 + $0x88] sm:$0xff] %v3152_v47 }
 0x687   : > { %v3156_v51 = vpop.eup %3155  ;;  %2443 = vst [vmem:[%s3882_s1 + $0xa8] sm:$0xff] %v3154_v48 }
 0x688   : > { %v3158_v53 = vpop.eup %3157  ;;  %2445 = vst [vmem:[%s3882_s1 + $0xb8] sm:$0xff] %v3156_v51 }
 0x689   : > { %v3160_v54 = vpop.eup %3159  ;;  %2444 = vst [vmem:[%s3882_s1 + $0xb0] sm:$0xff] %v3158_v53 }
 0x68a   : > { %2446 = vst [vmem:[%s3882_s1 + $0xc0] sm:$0xff] %v3160_v54 }
 0x68d   : > { %v2326_v59 = vpop.f32.mrb[36].mxu0  ;;  %v2931_v60 = vpop.f32.mrb[32].mxu1 }
 0x68e   : > { %v2327_v62 = vadd.f32 %v2326_v59, %v1882_v55  ;;  %v2388_v63 = vadd.f32 %v2931_v60, %v1890_v56  ;;  %v2328_v0 = vpop.f32.mrb[37].mxu0  ;;  %v2379_v1 = vpop.f32.mrb[33].mxu1 }
 0x68f   : > { %v2329_v2 = vadd.f32 %v2328_v0, %v1886_v57  ;;  %v2380_v3 = vadd.f32 %v2379_v1, %v1890_v56  ;;  %v2330_v58 = vpop.f32.mrb[38].mxu0  ;;  %v2932_v4 = vpop.f32.mrb[34].mxu1 }
 0x690   : > { %3161 = vtanh.f32 %v2327_v62  ;;  %v2331_v5 = vadd.f32 %v2330_v58, %v1882_v55  ;;  %v2332_v6 = vpop.f32.mrb[39].mxu0  ;;  %v2382_v7 = vpop.f32.mrb[35].mxu1  ;;  %v2391_v8 = vadd.f32 %v2932_v4, %v1890_v56 }
 0x691   : > { %3163 = vtanh.f32 %v2388_v63  ;;  %v2333_v9 = vadd.f32 %v2332_v6, %v1886_v57  ;;  %v2383_v61 = vadd.f32 %v2382_v7, %v1890_v56 }
 0x692   : > { %3165 = vtanh.f32 %v2329_v2 }
 0x693   : > { %3167 = vtanh.f32 %v2380_v3 }
 0x694   : > { %3169 = vtanh.f32 %v2331_v5 }
 0x695   : > { %3171 = vtanh.f32 %v2391_v8  ;;  %v2336_v10 = vpop.f32.mrb[40].mxu0 }
 0x696   : > { %3173 = vtanh.f32 %v2333_v9  ;;  %v2337_v11 = vadd.f32 %v2336_v10, %v1882_v55  ;;  %v2338_v12 = vpop.f32.mrb[41].mxu0 }
 0x697   : > { %3175 = vtanh.f32 %v2383_v61  ;;  %v2339_v13 = vadd.f32 %v2338_v12, %v1886_v57  ;;  %v2340_v14 = vpop.f32.mrb[42].mxu0 }
 0x698   : > { %3177 = vtanh.f32 %v2337_v11  ;;  %v2341_v15 = vadd.f32 %v2340_v14, %v1882_v55  ;;  %v2342_v16 = vpop.f32.mrb[43].mxu0 }
 0x699   : > { %3179 = vtanh.f32 %v2339_v13  ;;  %v2343_v17 = vadd.f32 %v2342_v16, %v1886_v57 }
 0x69a   : > { %v3162_v18 = vpop.eup %3161  ;;  %3181 = vtanh.f32 %v2341_v15 }
 0x69b   : > { %v3164_v19 = vpop.eup %3163  ;;  %2426 = vst [vmem:[%s3882_s1 + $0x20] sm:$0xff] %v3162_v18  ;;  %3183 = vtanh.f32 %v2343_v17 }
 0x69c   : > { %v3166_v20 = vpop.eup %3165  ;;  %2442 = vst.msk [vmem:[%s3882_s1 + $0xa0] sm:$0xff] %vm1036_vm0, %v3164_v19 }
 0x69d   : > { %v3168_v21 = vpop.eup %3167  ;;  %2427 = vst [vmem:[%s3882_s1 + $0x28] sm:$0xff] %v3166_v20 }
 0x69e   : > { %v3170_v22 = vpop.eup %3169  ;;  %2428 = vst.msk [vmem:[%s3882_s1 + $0x30] sm:$0xff] %vm1036_vm0, %v3168_v21 }
 0x69f   : > { %v3172_v23 = vpop.eup %3171  ;;  %2433 = vst [vmem:[%s3882_s1 + $0x58] sm:$0xff] %v3170_v22 }
 0x6a0   : > { %v3174_v24 = vpop.eup %3173  ;;  %2449 = vst.msk [vmem:[%s3882_s1 + $0xd8] sm:$0xff] %vm1036_vm0, %v3172_v23 }
 0x6a1   : > { %v3176_v25 = vpop.eup %3175  ;;  %2434 = vst [vmem:[%s3882_s1 + $0x60] sm:$0xff] %v3174_v24 }
 0x6a2   : > { %v3178_v26 = vpop.eup %3177  ;;  %2435 = vst.msk [vmem:[%s3882_s1 + $0x68] sm:$0xff] %vm1036_vm0, %v3176_v25 }
 0x6a3   : > { %v3180_v27 = vpop.eup %3179  ;;  %2440 = vst [vmem:[%s3882_s1 + $0x90] sm:$0xff] %v3178_v26 }
 0x6a4   : > { %v3182_v28 = vpop.eup %3181  ;;  %2441 = vst [vmem:[%s3882_s1 + $0x98] sm:$0xff] %v3180_v27 }
 0x6a5   : > { %v3184_v29 = vpop.eup %3183  ;;  %2447 = vst [vmem:[%s3882_s1 + $0xc8] sm:$0xff] %v3182_v28 }
 0x6a6   : > { %2448 = vst [vmem:[%s3882_s1 + $0xd0] sm:$0xff] %v3184_v29 }
 0x6a7   : > { %3198 = shalt.err (!%p3195_p3)
}
 0x6a8   : > { %s3199_s29 = scalar_lea.hbm %s3927_s0, 3584  ;;  %s3203_s19 = scalar_lea.hbm %s4020_s23, 7168 }
 0x6a9   : > { %p3200_p4 = scmp.ne.s32.totalorder %s3927_s0, %s3199_s29  ;;  %p3204_p9 = scmp.lt.u32.totalorder %s3927_s0, %s4020_s23 }
 0x6aa   : > { %p3205_p10 = scmp.lt.u32.totalorder %s3203_s19, %s3199_s29  ;;  %p3207_p12 = scmp.lt.u32.totalorder %s3199_s29, %s3927_s0 }
 0x6ab   : > { %p3201_p7 = pnand %p3200_p4, %p3386_p5 }
 0x6ac   : > { %p3206_p11 = por %p3205_p10, %p3204_p9 }
 0x6ad   : > { %p3202_p8 = pneg %p3201_p7 }
 0x6ae   : > { %p3208_p13 = por %p3207_p12, %p3206_p11 }
 0x6b0   : > { %p3209_p0 = pnand %p3208_p13, %p3202_p8 }
 0x6b2   : > { %3212 = shalt.err (!%p3209_p0)
}
 0x6b3   : > { %s3251_s25 = smov 896   ;;  %s3252_s22 = smov 56  }
 0x6b4   : > { %2939 = dma.vmem_to_hbm [thread:$0]  (%p3386_p5), %s3921_s18, 3584, %s3927_s0, %s3933_s24, %s3251_s25, %s3251_s25, %s3252_s22  }
 0x6b5 PF: > { %s4021_s30 = sld [smem:[#allocation7_spill]]  ;;  %s4022_s1 = sld [smem:[#allocation5_spill]] }
 0x6bb   : > { %p2945_p1 = scmp.ge.s32.totalorder %s4021_s30, 2  ;;  %s2497_s20 = sand.u32 1, %s4022_s1  }
 0x6bc   : > { %s2498_s29 = scalar_lea.sflag [#allocation3], %s2497_s20 }
 0x6bd   : > { %p2942_p2 = pnand %p2945_p1, %p3390_p6 }
 0x6bf   : > { %3230 = dma.done.wait (!%p2942_p2), %s2498_s29, 3584  }
 0x6c0   : > { %3232 = vsyncadd (!%p2942_p2), %s2498_s29, 4294963712  ;;  %s4024_s30 = sld [smem:[#allocation8_spill]]  ;;  %s4025_s19 = sld [smem:[#allocation6_spill]] }
 0x6c1   : > { %s4026_s29 = sld [smem:[#allocation9_spill]]  ;;  %s4027_s27 = smov %s3239_s28 }
 0x6c6   : > { %p29_p3 = scmp.ge.s32.totalorder %s4024_s30, 4   ;;  %s4028_s28 = smov %s4025_s19 }
 0x6c8   :  { %31 = sbr.rel (!%p29_p3) target bundleno = 8 (0x8), region = 135 }
 0x6cf   :  { %2503 = vsyncpa [#allocation3], 1 }
 0x6d0   :  { %2505 = vsyncpa [#allocation3 + $0x1], 1 }

</bundles_post_ra>
